<compile_context>
chip_gen: v5e
topology: v5e:2x2
jax: 0.10.0
libtpu: 0.0.40
codegen_flags: <defaults>
</compile_context>

<pallas_src>
import functools

import jax
import jax.numpy as jnp
import numpy as np
from jax.experimental import pallas as pl
from jax.experimental.pallas import tpu as pltpu

BOUNDARY = 416.0
NEG = -1e30
BATCH_BLOCK = 16  # default images per grid step (multiple of 8; one per sublane)


def _choose_batch_block(batch, desired=BATCH_BLOCK):
    """Pick a sublane batch block (multiple of 8); keep >= 2 grid steps when the
    batch allows it so both v7x TensorCores stay busy."""
    bb = max(8, (int(desired) // 8) * 8)
    while bb > 8 and pl.cdiv(batch, bb) < 2:
        bb -= 8
    return bb


def _detection_kernel(prop_ref, reg_ref, clf_ref, out_ref, *,
                      conf, nms_th, top_k, tpk_pad, length_thresh, unroll):
    # prop_ref: (2, bb, Npad)  rows: prop_x1, prop_x2
    # reg_ref : (2, bb, Npad)  rows: dx, dw
    # clf_ref : (1, bb, Npad)  row : score (padded lanes/rows hold NEG)
    # out_ref : (bb, 3*tpk_pad)  lane-dense slab: [x1 | x2 | score] per image
    px1 = prop_ref[0].astype(jnp.float32)   # (bb, Npad)
    px2 = prop_ref[1].astype(jnp.float32)
    dx = reg_ref[0].astype(jnp.float32)
    dw = reg_ref[1].astype(jnp.float32)
    sc = clf_ref[0].astype(jnp.float32)

    # --- BBoxTransform1D ---
    w = px2 - px1
    ctr = px1 + 0.5 * w
    pred_ctr = ctr + dx * w
    pred_w = jnp.exp(dw) * w
    x1 = pred_ctr - 0.5 * pred_w
    x2 = pred_ctr + 0.5 * pred_w

    # --- ClipBoxes1D ---
    x1 = jnp.clip(x1, 0.0, BOUNDARY)
    x2 = jnp.clip(x2, 0.0, BOUNDARY)

    # Loop-invariant predicted width (used by the length test and every union).
    wp = x2 - x1

    # Confidence + length thresholds.  Carry the masked score directly instead
    # of a separate bool mask -> one fewer N-wide select per iteration and a
    # smaller live set in the loop carry.
    msc0 = jnp.where((sc > conf) & (wp > length_thresh), sc, NEG)

    nb, n_lanes = x1.shape
    slot_idx = jax.lax.broadcasted_iota(jnp.int32, (1, tpk_pad), 1)

    def body(k, carry):
        msc, ax1, ax2, asc = carry
        lane_idx = jax.lax.broadcasted_iota(jnp.int32, (nb, n_lanes), 1)

        best = jnp.max(msc, axis=-1, keepdims=True)               # (bb,1)
        found = best > (0.5 * NEG)                                 # (bb,1) bool
        # argmax with stable (lowest-index) tie-break; `best` is a bitwise copy
        # of the max so the exact-equality compare is safe.
        cand = jnp.where(msc == best, lane_idx, n_lanes)
        bidx = jnp.min(cand, axis=-1, keepdims=True)               # (bb,1)
        onehot = lane_idx == bidx                                  # (bb,N) bool
        # Gather the selected box via max-select (no bool->f32 convert / mul);
        # x1/x2 >= 0 after clipping so NEG is a safe identity.
        bx1 = jnp.max(jnp.where(onehot, x1, NEG), axis=-1, keepdims=True)
        bx2 = jnp.max(jnp.where(onehot, x2, NEG), axis=-1, keepdims=True)
        bs = best  # selected box's score == masked max (saves an XLU reduction)

        # 1D IoU suppression without a divide:
        #   iou > th  <=>  inter > th * union   (union >= inter >= 0)
        inter = jnp.maximum(jnp.minimum(bx2, x2) - jnp.maximum(bx1, x1), 0.0)
        union = wp + (bx2 - bx1) - inter
        suppress = (inter > nms_th * union) | onehot
        msc = jnp.where(suppress & found, NEG, msc)

        slot = (slot_idx == k) & found                             # (bb,tpk_pad)
        ax1 = jnp.where(slot, bx1, ax1)
        ax2 = jnp.where(slot, bx2, ax2)
        asc = jnp.where(slot, bs, asc)
        return msc, ax1, ax2, asc

    init = (
        msc0,
        jnp.full((nb, tpk_pad), -1.0, jnp.float32),
        jnp.full((nb, tpk_pad), -1.0, jnp.float32),
        jnp.full((nb, tpk_pad), -1.0, jnp.float32),
    )
    _, ax1, ax2, asc = jax.lax.fori_loop(0, top_k, body, init, unroll=unroll)

    # lane-dense 128-aligned stores (unmasked full-width vst)
    out_ref[:, 0 * tpk_pad:1 * tpk_pad] = ax1
    out_ref[:, 1 * tpk_pad:2 * tpk_pad] = ax2
    out_ref[:, 2 * tpk_pad:3 * tpk_pad] = asc


def detection1d_pallas(clf_proba, reg_preds_all, all_proposal_boxes,
                       conf_threshold=0.01, nms_threshold=0.5, top_k=10,
                       length_thresh=3.0, batch_block=BATCH_BLOCK):
    """clf_proba: [B,N,1], reg_preds_all: [B,N,2], all_proposal_boxes: [B,N,2]
    -> detections [B, top_k, 3] (cols = x1, x2, score; unfilled rows are -1)."""
    B, N, C = clf_proba.shape
    assert C == 1, "kernel implements the default num_classes=1 configuration"
    assert reg_preds_all.shape == (B, N, 2)
    assert all_proposal_boxes.shape == (B, N, 2)

    bb = _choose_batch_block(B, batch_block)
    b_pad = pl.cdiv(B, bb) * bb
    n_pad = pl.cdiv(N, 128) * 128        # lane padding: unmasked full-vreg ops
    tpk_pad = pl.cdiv(top_k, 128) * 128  # lane-dense output width per channel
    pad_b = b_pad - B
    pad_n = n_pad - N

    # channels-first, batch on sublanes, proposals on lanes.  Padded score
    # lanes/rows get NEG so they can never pass the confidence threshold
    # (even if conf_threshold <= 0); padded geometry is zero (harmless).
    prop_cf = jnp.transpose(all_proposal_boxes, (2, 0, 1))  # [2, B, N]
    reg_cf = jnp.transpose(reg_preds_all, (2, 0, 1))        # [2, B, N]
    clf_cf = jnp.transpose(clf_proba, (2, 0, 1))            # [1, B, N]
    if pad_b or pad_n:
        cfg = ((0, 0), (0, pad_b), (0, pad_n))
        prop_cf = jnp.pad(prop_cf, cfg)
        reg_cf = jnp.pad(reg_cf, cfg)
        clf_cf = jnp.pad(clf_cf, cfg, constant_values=NEG)

    # Gate loop unrolling on top_k to keep code size / vreg pressure bounded.
    top_k = int(top_k)
    if top_k <= 16:
        unroll = True
    elif top_k <= 64:
        unroll = 8
    else:
        unroll = 4
    # TODO(synk): for top_k > 128, spill completed 128-slot accumulator chunks
    # to out_ref instead of keeping the full (bb, tpk_pad) accumulators live.

    # Scoped VMEM: double-buffered inputs + double-buffered output + slack.
    vmem_need = 2 * (5 * bb * n_pad * 4) + 2 * (bb * 3 * tpk_pad * 4) + (2 << 20)
    vmem_limit = int(min(max(vmem_need, 16 << 20), 48 << 20))

    kernel = functools.partial(
        _detection_kernel, conf=float(conf_threshold),
        nms_th=float(nms_threshold), top_k=top_k, tpk_pad=int(tpk_pad),
        length_thresh=float(length_thresh), unroll=unroll)

    out = pl.pallas_call(
        kernel,
        out_shape=jax.ShapeDtypeStruct((b_pad, 3 * tpk_pad), jnp.float32),
        grid_spec=pltpu.PrefetchScalarGridSpec(
            num_scalar_prefetch=0,
            grid=(b_pad // bb,),
            in_specs=[
                pl.BlockSpec((2, bb, n_pad), lambda b: (0, b, 0)),
                pl.BlockSpec((2, bb, n_pad), lambda b: (0, b, 0)),
                pl.BlockSpec((1, bb, n_pad), lambda b: (0, b, 0)),
            ],
            out_specs=pl.BlockSpec((bb, 3 * tpk_pad), lambda b: (b, 0)),
        ),
        compiler_params=pltpu.CompilerParams(
            dimension_semantics=("parallel",),
            vmem_limit_bytes=vmem_limit,
            allow_input_fusion=[True, True, True],
        ),
    )(prop_cf, reg_cf, clf_cf)

    det = out[:B].reshape(B, 3, tpk_pad)[:, :, :top_k]  # [B, 3, top_k]
    return jnp.transpose(det, (0, 2, 1))                # [B, top_k, 3]


def _reference_numpy(clf, reg, prop, conf=0.01, nms_th=0.5, top_k=10,
                     length_thresh=3.0):
    clf, reg, prop = [np.asarray(a, np.float32) for a in (clf, reg, prop)]
    B, N, C = clf.shape
    det = -np.ones((B, top_k, 3), np.float32)
    w = prop[..., 1] - prop[..., 0]
    ctr = prop[..., 0] + 0.5 * w
    pctr = ctr + reg[..., 0] * w
    pw = np.exp(reg[..., 1]) * w
    x1 = np.clip(pctr - 0.5 * pw, 0.0, BOUNDARY)
    x2 = np.clip(pctr + 0.5 * pw, 0.0, BOUNDARY)
    for cl in range(C):
        for i in range(B):
            s = clf[i, :, cl]
            m = s > conf
            bx1, bx2, bs = x1[i][m], x2[i][m], s[m]
            lm = (bx2 - bx1) > length_thresh
            bx1, bx2, bs = bx1[lm], bx2[lm], bs[lm]
            order = np.argsort(-bs, kind="stable")
            keep = []
            while order.size and len(keep) < top_k:
                j = order[0]
                keep.append(j)
                rest = order[1:]
                inter = np.maximum(
                    np.minimum(bx2[j], bx2[rest]) - np.maximum(bx1[j], bx1[rest]), 0.0)
                union = (bx2[rest] - bx1[rest]) + (bx2[j] - bx1[j]) - inter
                iou = inter / np.maximum(union, 1e-8)
                order = rest[iou <= nms_th]
            for r, j in enumerate(keep):
                det[i, r] = [bx1[j], bx2[j], bs[j]]
    return det


if __name__ == "__main__":
    key = jax.random.PRNGKey(0)
    B, N = 2, 16
    k1, k2, k3, k4 = jax.random.split(key, 4)

    # proposals: x1 in [0, 350), width in [5, 60)
    p_x1 = jax.random.uniform(k1, (B, N), minval=0.0, maxval=350.0)
    p_w = jax.random.uniform(k2, (B, N), minval=5.0, maxval=60.0)
    all_proposal_boxes = jnp.stack([p_x1, p_x1 + p_w], axis=-1)            # [B,N,2]
    reg_preds_all = 0.1 * jax.random.normal(k3, (B, N, 2))                 # [B,N,2]
    clf_proba = jax.random.uniform(k4, (B, N, 1), minval=0.0, maxval=1.0)  # [B,N,1]

    detections = detection1d_pallas(clf_proba, reg_preds_all, all_proposal_boxes)
    detections = jax.block_until_ready(detections)

    ref = _reference_numpy(clf_proba, reg_preds_all, all_proposal_boxes)
    np.testing.assert_allclose(np.asarray(detections), ref, atol=1e-2, rtol=1e-3)

    print("KERNEL_OK")
</pallas_src>

<mosaic_0001>
module attributes {stable_mosaic.version = 11 : i64} {
  func.func @_detection_kernel(%arg0: i32, %arg1: memref<2x8x128xf32, #tpu.memory_space<vmem>>, %arg2: memref<2x8x128xf32, #tpu.memory_space<vmem>>, %arg3: memref<1x8x128xf32, #tpu.memory_space<vmem>>, %arg4: memref<8x384xf32, #tpu.memory_space<vmem>>) attributes {dimension_semantics = [#tpu.dimension_semantics<parallel>], iteration_bounds = array<i64: 1>, scalar_prefetch = 0 : i64, scratch_operands = 0 : i64, tpu.core_type = #tpu.core_type<tc>, window_params = [{transform_indices = @transform_0, window_bounds = array<i64: 2, 8, 128>}, {transform_indices = @transform_1, window_bounds = array<i64: 2, 8, 128>}, {transform_indices = @transform_2, window_bounds = array<i64: 1, 8, 128>}, {transform_indices = @transform_3, window_bounds = array<i64: 8, 384>}]} {
    %c0 = arith.constant 0 : index
    %c0_0 = arith.constant 0 : index
    %c0_1 = arith.constant 0 : index
    %0 = vector.load %arg1[%c0, %c0_0, %c0_1] : memref<2x8x128xf32, #tpu.memory_space<vmem>>, vector<1x8x128xf32>
    %1 = vector.shape_cast %0 : vector<1x8x128xf32> to vector<8x128xf32>
    %c1 = arith.constant 1 : index
    %c0_2 = arith.constant 0 : index
    %c0_3 = arith.constant 0 : index
    %2 = vector.load %arg1[%c1, %c0_2, %c0_3] : memref<2x8x128xf32, #tpu.memory_space<vmem>>, vector<1x8x128xf32>
    %3 = vector.shape_cast %2 : vector<1x8x128xf32> to vector<8x128xf32>
    %c0_4 = arith.constant 0 : index
    %c0_5 = arith.constant 0 : index
    %c0_6 = arith.constant 0 : index
    %4 = vector.load %arg2[%c0_4, %c0_5, %c0_6] : memref<2x8x128xf32, #tpu.memory_space<vmem>>, vector<1x8x128xf32>
    %5 = vector.shape_cast %4 : vector<1x8x128xf32> to vector<8x128xf32>
    %c1_7 = arith.constant 1 : index
    %c0_8 = arith.constant 0 : index
    %c0_9 = arith.constant 0 : index
    %6 = vector.load %arg2[%c1_7, %c0_8, %c0_9] : memref<2x8x128xf32, #tpu.memory_space<vmem>>, vector<1x8x128xf32>
    %7 = vector.shape_cast %6 : vector<1x8x128xf32> to vector<8x128xf32>
    %c0_10 = arith.constant 0 : index
    %c0_11 = arith.constant 0 : index
    %c0_12 = arith.constant 0 : index
    %8 = vector.load %arg3[%c0_10, %c0_11, %c0_12] : memref<1x8x128xf32, #tpu.memory_space<vmem>>, vector<1x8x128xf32>
    %9 = vector.shape_cast %8 : vector<1x8x128xf32> to vector<8x128xf32>
    %10 = arith.subf %3, %1 : vector<8x128xf32>
    %cst = arith.constant 5.000000e-01 : f32
    %11 = vector.broadcast %cst : f32 to vector<8x128xf32>
    %12 = arith.mulf %11, %10 : vector<8x128xf32>
    %13 = arith.addf %1, %12 : vector<8x128xf32>
    %14 = arith.mulf %5, %10 : vector<8x128xf32>
    %15 = arith.addf %13, %14 : vector<8x128xf32>
    %16 = math.exp %7 : vector<8x128xf32>
    %17 = arith.mulf %16, %10 : vector<8x128xf32>
    %cst_13 = arith.constant 5.000000e-01 : f32
    %18 = vector.broadcast %cst_13 : f32 to vector<8x128xf32>
    %19 = arith.mulf %18, %17 : vector<8x128xf32>
    %20 = arith.subf %15, %19 : vector<8x128xf32>
    %cst_14 = arith.constant 5.000000e-01 : f32
    %21 = vector.broadcast %cst_14 : f32 to vector<8x128xf32>
    %22 = arith.mulf %21, %17 : vector<8x128xf32>
    %23 = arith.addf %15, %22 : vector<8x128xf32>
    %cst_15 = arith.constant 0.000000e+00 : f32
    %cst_16 = arith.constant 4.160000e+02 : f32
    %24 = vector.broadcast %cst_15 : f32 to vector<8x128xf32>
    %25 = arith.maximumf %24, %20 : vector<8x128xf32>
    %26 = vector.broadcast %cst_16 : f32 to vector<8x128xf32>
    %27 = arith.minimumf %26, %25 : vector<8x128xf32>
    %cst_17 = arith.constant 0.000000e+00 : f32
    %cst_18 = arith.constant 4.160000e+02 : f32
    %28 = vector.broadcast %cst_17 : f32 to vector<8x128xf32>
    %29 = arith.maximumf %28, %23 : vector<8x128xf32>
    %30 = vector.broadcast %cst_18 : f32 to vector<8x128xf32>
    %31 = arith.minimumf %30, %29 : vector<8x128xf32>
    %32 = arith.subf %31, %27 : vector<8x128xf32>
    %cst_19 = arith.constant 0.00999999977 : f32
    %33 = vector.broadcast %cst_19 : f32 to vector<8x128xf32>
    %34 = arith.cmpf ogt, %9, %33 : vector<8x128xf32>
    %cst_20 = arith.constant 3.000000e+00 : f32
    %35 = vector.broadcast %cst_20 : f32 to vector<8x128xf32>
    %36 = arith.cmpf ogt, %32, %35 : vector<8x128xf32>
    %37 = arith.andi %34, %36 : vector<8x128xi1>
    %cst_21 = arith.constant -1.000000e+30 : f32
    %38 = vector.broadcast %cst_21 : f32 to vector<8x128xf32>
    %39 = arith.select %37, %9, %38 : vector<8x128xi1>, vector<8x128xf32>
    %40 = tpu.iota {dimensions = array<i32: 1>} : vector<1x128xi32>
    %cst_22 = arith.constant -1.000000e+00 : f32
    %41 = vector.broadcast %cst_22 : f32 to vector<8x128xf32>
    %cst_23 = arith.constant -1.000000e+00 : f32
    %42 = vector.broadcast %cst_23 : f32 to vector<8x128xf32>
    %cst_24 = arith.constant -1.000000e+00 : f32
    %43 = vector.broadcast %cst_24 : f32 to vector<8x128xf32>
    %c0_i32 = arith.constant 0 : i32
    %44 = tpu.iota {dimensions = array<i32: 1>} : vector<8x128xi32>
    %cst_25 = arith.constant dense<0xFF800000> : vector<8xf32>
    %45 = vector.multi_reduction <maximumf>, %39, %cst_25 [1] : vector<8x128xf32> to vector<8xf32>
    %46 = vector.shape_cast %45 : vector<8xf32> to vector<8x1xf32>
    %cst_26 = arith.constant -5.000000e+29 : f32
    %47 = vector.broadcast %cst_26 : f32 to vector<8x1xf32>
    %48 = arith.cmpf ogt, %46, %47 : vector<8x1xf32>
    %49 = vector.broadcast %46 : vector<8x1xf32> to vector<8x128xf32>
    %50 = arith.cmpf oeq, %39, %49 : vector<8x128xf32>
    %c128_i32 = arith.constant 128 : i32
    %51 = vector.broadcast %c128_i32 : i32 to vector<8x128xi32>
    %52 = arith.select %50, %44, %51 : vector<8x128xi1>, vector<8x128xi32>
    %cst_27 = arith.constant dense<2147483647> : vector<8xi32>
    %53 = vector.multi_reduction <minsi>, %52, %cst_27 [1] : vector<8x128xi32> to vector<8xi32>
    %54 = vector.shape_cast %53 : vector<8xi32> to vector<8x1xi32>
    %55 = vector.broadcast %54 : vector<8x1xi32> to vector<8x128xi32>
    %56 = arith.cmpi eq, %44, %55 : vector<8x128xi32>
    %cst_28 = arith.constant -1.000000e+30 : f32
    %57 = vector.broadcast %cst_28 : f32 to vector<8x128xf32>
    %58 = arith.select %56, %27, %57 : vector<8x128xi1>, vector<8x128xf32>
    %cst_29 = arith.constant dense<0xFF800000> : vector<8xf32>
    %59 = vector.multi_reduction <maximumf>, %58, %cst_29 [1] : vector<8x128xf32> to vector<8xf32>
    %60 = vector.shape_cast %59 : vector<8xf32> to vector<8x1xf32>
    %cst_30 = arith.constant -1.000000e+30 : f32
    %61 = vector.broadcast %cst_30 : f32 to vector<8x128xf32>
    %62 = arith.select %56, %31, %61 : vector<8x128xi1>, vector<8x128xf32>
    %cst_31 = arith.constant dense<0xFF800000> : vector<8xf32>
    %63 = vector.multi_reduction <maximumf>, %62, %cst_31 [1] : vector<8x128xf32> to vector<8xf32>
    %64 = vector.shape_cast %63 : vector<8xf32> to vector<8x1xf32>
    %65 = vector.broadcast %64 : vector<8x1xf32> to vector<8x128xf32>
    %66 = arith.minimumf %65, %31 : vector<8x128xf32>
    %67 = vector.broadcast %60 : vector<8x1xf32> to vector<8x128xf32>
    %68 = arith.maximumf %67, %27 : vector<8x128xf32>
    %69 = arith.subf %66, %68 : vector<8x128xf32>
    %cst_32 = arith.constant 0.000000e+00 : f32
    %70 = vector.broadcast %cst_32 : f32 to vector<8x128xf32>
    %71 = arith.maximumf %69, %70 : vector<8x128xf32>
    %72 = arith.subf %64, %60 : vector<8x1xf32>
    %73 = vector.broadcast %72 : vector<8x1xf32> to vector<8x128xf32>
    %74 = arith.addf %32, %73 : vector<8x128xf32>
    %75 = arith.subf %74, %71 : vector<8x128xf32>
    %cst_33 = arith.constant 5.000000e-01 : f32
    %76 = vector.broadcast %cst_33 : f32 to vector<8x128xf32>
    %77 = arith.mulf %76, %75 : vector<8x128xf32>
    %78 = arith.cmpf ogt, %71, %77 : vector<8x128xf32>
    %79 = arith.ori %78, %56 : vector<8x128xi1>
    %80 = vector.broadcast %48 : vector<8x1xi1> to vector<8x128xi1>
    %81 = arith.andi %79, %80 : vector<8x128xi1>
    %cst_34 = arith.constant -1.000000e+30 : f32
    %82 = vector.broadcast %cst_34 : f32 to vector<8x128xf32>
    %83 = arith.select %81, %82, %39 : vector<8x128xi1>, vector<8x128xf32>
    %84 = vector.broadcast %c0_i32 : i32 to vector<1x128xi32>
    %85 = arith.cmpi eq, %40, %84 : vector<1x128xi32>
    %86 = vector.broadcast %85 : vector<1x128xi1> to vector<8x128xi1>
    %87 = vector.broadcast %48 : vector<8x1xi1> to vector<8x128xi1>
    %88 = arith.andi %86, %87 : vector<8x128xi1>
    %89 = vector.shape_cast %60 : vector<8x1xf32> to vector<8x1xf32>
    %90 = vector.broadcast %89 : vector<8x1xf32> to vector<8x128xf32>
    %91 = arith.select %88, %90, %41 : vector<8x128xi1>, vector<8x128xf32>
    %92 = vector.shape_cast %64 : vector<8x1xf32> to vector<8x1xf32>
    %93 = vector.broadcast %92 : vector<8x1xf32> to vector<8x128xf32>
    %94 = arith.select %88, %93, %42 : vector<8x128xi1>, vector<8x128xf32>
    %95 = vector.shape_cast %46 : vector<8x1xf32> to vector<8x1xf32>
    %96 = vector.broadcast %95 : vector<8x1xf32> to vector<8x128xf32>
    %97 = arith.select %88, %96, %43 : vector<8x128xi1>, vector<8x128xf32>
    %c1_i32 = arith.constant 1 : i32
    %98 = tpu.iota {dimensions = array<i32: 1>} : vector<8x128xi32>
    %cst_35 = arith.constant dense<0xFF800000> : vector<8xf32>
    %99 = vector.multi_reduction <maximumf>, %83, %cst_35 [1] : vector<8x128xf32> to vector<8xf32>
    %100 = vector.shape_cast %99 : vector<8xf32> to vector<8x1xf32>
    %cst_36 = arith.constant -5.000000e+29 : f32
    %101 = vector.broadcast %cst_36 : f32 to vector<8x1xf32>
    %102 = arith.cmpf ogt, %100, %101 : vector<8x1xf32>
    %103 = vector.broadcast %100 : vector<8x1xf32> to vector<8x128xf32>
    %104 = arith.cmpf oeq, %83, %103 : vector<8x128xf32>
    %c128_i32_37 = arith.constant 128 : i32
    %105 = vector.broadcast %c128_i32_37 : i32 to vector<8x128xi32>
    %106 = arith.select %104, %98, %105 : vector<8x128xi1>, vector<8x128xi32>
    %cst_38 = arith.constant dense<2147483647> : vector<8xi32>
    %107 = vector.multi_reduction <minsi>, %106, %cst_38 [1] : vector<8x128xi32> to vector<8xi32>
    %108 = vector.shape_cast %107 : vector<8xi32> to vector<8x1xi32>
    %109 = vector.broadcast %108 : vector<8x1xi32> to vector<8x128xi32>
    %110 = arith.cmpi eq, %98, %109 : vector<8x128xi32>
    %cst_39 = arith.constant -1.000000e+30 : f32
    %111 = vector.broadcast %cst_39 : f32 to vector<8x128xf32>
    %112 = arith.select %110, %27, %111 : vector<8x128xi1>, vector<8x128xf32>
    %cst_40 = arith.constant dense<0xFF800000> : vector<8xf32>
    %113 = vector.multi_reduction <maximumf>, %112, %cst_40 [1] : vector<8x128xf32> to vector<8xf32>
    %114 = vector.shape_cast %113 : vector<8xf32> to vector<8x1xf32>
    %cst_41 = arith.constant -1.000000e+30 : f32
    %115 = vector.broadcast %cst_41 : f32 to vector<8x128xf32>
    %116 = arith.select %110, %31, %115 : vector<8x128xi1>, vector<8x128xf32>
    %cst_42 = arith.constant dense<0xFF800000> : vector<8xf32>
    %117 = vector.multi_reduction <maximumf>, %116, %cst_42 [1] : vector<8x128xf32> to vector<8xf32>
    %118 = vector.shape_cast %117 : vector<8xf32> to vector<8x1xf32>
    %119 = vector.broadcast %118 : vector<8x1xf32> to vector<8x128xf32>
    %120 = arith.minimumf %119, %31 : vector<8x128xf32>
    %121 = vector.broadcast %114 : vector<8x1xf32> to vector<8x128xf32>
    %122 = arith.maximumf %121, %27 : vector<8x128xf32>
    %123 = arith.subf %120, %122 : vector<8x128xf32>
    %cst_43 = arith.constant 0.000000e+00 : f32
    %124 = vector.broadcast %cst_43 : f32 to vector<8x128xf32>
    %125 = arith.maximumf %123, %124 : vector<8x128xf32>
    %126 = arith.subf %118, %114 : vector<8x1xf32>
    %127 = vector.broadcast %126 : vector<8x1xf32> to vector<8x128xf32>
    %128 = arith.addf %32, %127 : vector<8x128xf32>
    %129 = arith.subf %128, %125 : vector<8x128xf32>
    %cst_44 = arith.constant 5.000000e-01 : f32
    %130 = vector.broadcast %cst_44 : f32 to vector<8x128xf32>
    %131 = arith.mulf %130, %129 : vector<8x128xf32>
    %132 = arith.cmpf ogt, %125, %131 : vector<8x128xf32>
    %133 = arith.ori %132, %110 : vector<8x128xi1>
    %134 = vector.broadcast %102 : vector<8x1xi1> to vector<8x128xi1>
    %135 = arith.andi %133, %134 : vector<8x128xi1>
    %cst_45 = arith.constant -1.000000e+30 : f32
    %136 = vector.broadcast %cst_45 : f32 to vector<8x128xf32>
    %137 = arith.select %135, %136, %83 : vector<8x128xi1>, vector<8x128xf32>
    %138 = vector.broadcast %c1_i32 : i32 to vector<1x128xi32>
    %139 = arith.cmpi eq, %40, %138 : vector<1x128xi32>
    %140 = vector.broadcast %139 : vector<1x128xi1> to vector<8x128xi1>
    %141 = vector.broadcast %102 : vector<8x1xi1> to vector<8x128xi1>
    %142 = arith.andi %140, %141 : vector<8x128xi1>
    %143 = vector.shape_cast %114 : vector<8x1xf32> to vector<8x1xf32>
    %144 = vector.broadcast %143 : vector<8x1xf32> to vector<8x128xf32>
    %145 = arith.select %142, %144, %91 : vector<8x128xi1>, vector<8x128xf32>
    %146 = vector.shape_cast %118 : vector<8x1xf32> to vector<8x1xf32>
    %147 = vector.broadcast %146 : vector<8x1xf32> to vector<8x128xf32>
    %148 = arith.select %142, %147, %94 : vector<8x128xi1>, vector<8x128xf32>
    %149 = vector.shape_cast %100 : vector<8x1xf32> to vector<8x1xf32>
    %150 = vector.broadcast %149 : vector<8x1xf32> to vector<8x128xf32>
    %151 = arith.select %142, %150, %97 : vector<8x128xi1>, vector<8x128xf32>
    %c2_i32 = arith.constant 2 : i32
    %152 = tpu.iota {dimensions = array<i32: 1>} : vector<8x128xi32>
    %cst_46 = arith.constant dense<0xFF800000> : vector<8xf32>
    %153 = vector.multi_reduction <maximumf>, %137, %cst_46 [1] : vector<8x128xf32> to vector<8xf32>
    %154 = vector.shape_cast %153 : vector<8xf32> to vector<8x1xf32>
    %cst_47 = arith.constant -5.000000e+29 : f32
    %155 = vector.broadcast %cst_47 : f32 to vector<8x1xf32>
    %156 = arith.cmpf ogt, %154, %155 : vector<8x1xf32>
    %157 = vector.broadcast %154 : vector<8x1xf32> to vector<8x128xf32>
    %158 = arith.cmpf oeq, %137, %157 : vector<8x128xf32>
    %c128_i32_48 = arith.constant 128 : i32
    %159 = vector.broadcast %c128_i32_48 : i32 to vector<8x128xi32>
    %160 = arith.select %158, %152, %159 : vector<8x128xi1>, vector<8x128xi32>
    %cst_49 = arith.constant dense<2147483647> : vector<8xi32>
    %161 = vector.multi_reduction <minsi>, %160, %cst_49 [1] : vector<8x128xi32> to vector<8xi32>
    %162 = vector.shape_cast %161 : vector<8xi32> to vector<8x1xi32>
    %163 = vector.broadcast %162 : vector<8x1xi32> to vector<8x128xi32>
    %164 = arith.cmpi eq, %152, %163 : vector<8x128xi32>
    %cst_50 = arith.constant -1.000000e+30 : f32
    %165 = vector.broadcast %cst_50 : f32 to vector<8x128xf32>
    %166 = arith.select %164, %27, %165 : vector<8x128xi1>, vector<8x128xf32>
    %cst_51 = arith.constant dense<0xFF800000> : vector<8xf32>
    %167 = vector.multi_reduction <maximumf>, %166, %cst_51 [1] : vector<8x128xf32> to vector<8xf32>
    %168 = vector.shape_cast %167 : vector<8xf32> to vector<8x1xf32>
    %cst_52 = arith.constant -1.000000e+30 : f32
    %169 = vector.broadcast %cst_52 : f32 to vector<8x128xf32>
    %170 = arith.select %164, %31, %169 : vector<8x128xi1>, vector<8x128xf32>
    %cst_53 = arith.constant dense<0xFF800000> : vector<8xf32>
    %171 = vector.multi_reduction <maximumf>, %170, %cst_53 [1] : vector<8x128xf32> to vector<8xf32>
    %172 = vector.shape_cast %171 : vector<8xf32> to vector<8x1xf32>
    %173 = vector.broadcast %172 : vector<8x1xf32> to vector<8x128xf32>
    %174 = arith.minimumf %173, %31 : vector<8x128xf32>
    %175 = vector.broadcast %168 : vector<8x1xf32> to vector<8x128xf32>
    %176 = arith.maximumf %175, %27 : vector<8x128xf32>
    %177 = arith.subf %174, %176 : vector<8x128xf32>
    %cst_54 = arith.constant 0.000000e+00 : f32
    %178 = vector.broadcast %cst_54 : f32 to vector<8x128xf32>
    %179 = arith.maximumf %177, %178 : vector<8x128xf32>
    %180 = arith.subf %172, %168 : vector<8x1xf32>
    %181 = vector.broadcast %180 : vector<8x1xf32> to vector<8x128xf32>
    %182 = arith.addf %32, %181 : vector<8x128xf32>
    %183 = arith.subf %182, %179 : vector<8x128xf32>
    %cst_55 = arith.constant 5.000000e-01 : f32
    %184 = vector.broadcast %cst_55 : f32 to vector<8x128xf32>
    %185 = arith.mulf %184, %183 : vector<8x128xf32>
    %186 = arith.cmpf ogt, %179, %185 : vector<8x128xf32>
    %187 = arith.ori %186, %164 : vector<8x128xi1>
    %188 = vector.broadcast %156 : vector<8x1xi1> to vector<8x128xi1>
    %189 = arith.andi %187, %188 : vector<8x128xi1>
    %cst_56 = arith.constant -1.000000e+30 : f32
    %190 = vector.broadcast %cst_56 : f32 to vector<8x128xf32>
    %191 = arith.select %189, %190, %137 : vector<8x128xi1>, vector<8x128xf32>
    %192 = vector.broadcast %c2_i32 : i32 to vector<1x128xi32>
    %193 = arith.cmpi eq, %40, %192 : vector<1x128xi32>
    %194 = vector.broadcast %193 : vector<1x128xi1> to vector<8x128xi1>
    %195 = vector.broadcast %156 : vector<8x1xi1> to vector<8x128xi1>
    %196 = arith.andi %194, %195 : vector<8x128xi1>
    %197 = vector.shape_cast %168 : vector<8x1xf32> to vector<8x1xf32>
    %198 = vector.broadcast %197 : vector<8x1xf32> to vector<8x128xf32>
    %199 = arith.select %196, %198, %145 : vector<8x128xi1>, vector<8x128xf32>
    %200 = vector.shape_cast %172 : vector<8x1xf32> to vector<8x1xf32>
    %201 = vector.broadcast %200 : vector<8x1xf32> to vector<8x128xf32>
    %202 = arith.select %196, %201, %148 : vector<8x128xi1>, vector<8x128xf32>
    %203 = vector.shape_cast %154 : vector<8x1xf32> to vector<8x1xf32>
    %204 = vector.broadcast %203 : vector<8x1xf32> to vector<8x128xf32>
    %205 = arith.select %196, %204, %151 : vector<8x128xi1>, vector<8x128xf32>
    %c3_i32 = arith.constant 3 : i32
    %206 = tpu.iota {dimensions = array<i32: 1>} : vector<8x128xi32>
    %cst_57 = arith.constant dense<0xFF800000> : vector<8xf32>
    %207 = vector.multi_reduction <maximumf>, %191, %cst_57 [1] : vector<8x128xf32> to vector<8xf32>
    %208 = vector.shape_cast %207 : vector<8xf32> to vector<8x1xf32>
    %cst_58 = arith.constant -5.000000e+29 : f32
    %209 = vector.broadcast %cst_58 : f32 to vector<8x1xf32>
    %210 = arith.cmpf ogt, %208, %209 : vector<8x1xf32>
    %211 = vector.broadcast %208 : vector<8x1xf32> to vector<8x128xf32>
    %212 = arith.cmpf oeq, %191, %211 : vector<8x128xf32>
    %c128_i32_59 = arith.constant 128 : i32
    %213 = vector.broadcast %c128_i32_59 : i32 to vector<8x128xi32>
    %214 = arith.select %212, %206, %213 : vector<8x128xi1>, vector<8x128xi32>
    %cst_60 = arith.constant dense<2147483647> : vector<8xi32>
    %215 = vector.multi_reduction <minsi>, %214, %cst_60 [1] : vector<8x128xi32> to vector<8xi32>
    %216 = vector.shape_cast %215 : vector<8xi32> to vector<8x1xi32>
    %217 = vector.broadcast %216 : vector<8x1xi32> to vector<8x128xi32>
    %218 = arith.cmpi eq, %206, %217 : vector<8x128xi32>
    %cst_61 = arith.constant -1.000000e+30 : f32
    %219 = vector.broadcast %cst_61 : f32 to vector<8x128xf32>
    %220 = arith.select %218, %27, %219 : vector<8x128xi1>, vector<8x128xf32>
    %cst_62 = arith.constant dense<0xFF800000> : vector<8xf32>
    %221 = vector.multi_reduction <maximumf>, %220, %cst_62 [1] : vector<8x128xf32> to vector<8xf32>
    %222 = vector.shape_cast %221 : vector<8xf32> to vector<8x1xf32>
    %cst_63 = arith.constant -1.000000e+30 : f32
    %223 = vector.broadcast %cst_63 : f32 to vector<8x128xf32>
    %224 = arith.select %218, %31, %223 : vector<8x128xi1>, vector<8x128xf32>
    %cst_64 = arith.constant dense<0xFF800000> : vector<8xf32>
    %225 = vector.multi_reduction <maximumf>, %224, %cst_64 [1] : vector<8x128xf32> to vector<8xf32>
    %226 = vector.shape_cast %225 : vector<8xf32> to vector<8x1xf32>
    %227 = vector.broadcast %226 : vector<8x1xf32> to vector<8x128xf32>
    %228 = arith.minimumf %227, %31 : vector<8x128xf32>
    %229 = vector.broadcast %222 : vector<8x1xf32> to vector<8x128xf32>
    %230 = arith.maximumf %229, %27 : vector<8x128xf32>
    %231 = arith.subf %228, %230 : vector<8x128xf32>
    %cst_65 = arith.constant 0.000000e+00 : f32
    %232 = vector.broadcast %cst_65 : f32 to vector<8x128xf32>
    %233 = arith.maximumf %231, %232 : vector<8x128xf32>
    %234 = arith.subf %226, %222 : vector<8x1xf32>
    %235 = vector.broadcast %234 : vector<8x1xf32> to vector<8x128xf32>
    %236 = arith.addf %32, %235 : vector<8x128xf32>
    %237 = arith.subf %236, %233 : vector<8x128xf32>
    %cst_66 = arith.constant 5.000000e-01 : f32
    %238 = vector.broadcast %cst_66 : f32 to vector<8x128xf32>
    %239 = arith.mulf %238, %237 : vector<8x128xf32>
    %240 = arith.cmpf ogt, %233, %239 : vector<8x128xf32>
    %241 = arith.ori %240, %218 : vector<8x128xi1>
    %242 = vector.broadcast %210 : vector<8x1xi1> to vector<8x128xi1>
    %243 = arith.andi %241, %242 : vector<8x128xi1>
    %cst_67 = arith.constant -1.000000e+30 : f32
    %244 = vector.broadcast %cst_67 : f32 to vector<8x128xf32>
    %245 = arith.select %243, %244, %191 : vector<8x128xi1>, vector<8x128xf32>
    %246 = vector.broadcast %c3_i32 : i32 to vector<1x128xi32>
    %247 = arith.cmpi eq, %40, %246 : vector<1x128xi32>
    %248 = vector.broadcast %247 : vector<1x128xi1> to vector<8x128xi1>
    %249 = vector.broadcast %210 : vector<8x1xi1> to vector<8x128xi1>
    %250 = arith.andi %248, %249 : vector<8x128xi1>
    %251 = vector.shape_cast %222 : vector<8x1xf32> to vector<8x1xf32>
    %252 = vector.broadcast %251 : vector<8x1xf32> to vector<8x128xf32>
    %253 = arith.select %250, %252, %199 : vector<8x128xi1>, vector<8x128xf32>
    %254 = vector.shape_cast %226 : vector<8x1xf32> to vector<8x1xf32>
    %255 = vector.broadcast %254 : vector<8x1xf32> to vector<8x128xf32>
    %256 = arith.select %250, %255, %202 : vector<8x128xi1>, vector<8x128xf32>
    %257 = vector.shape_cast %208 : vector<8x1xf32> to vector<8x1xf32>
    %258 = vector.broadcast %257 : vector<8x1xf32> to vector<8x128xf32>
    %259 = arith.select %250, %258, %205 : vector<8x128xi1>, vector<8x128xf32>
    %c4_i32 = arith.constant 4 : i32
    %260 = tpu.iota {dimensions = array<i32: 1>} : vector<8x128xi32>
    %cst_68 = arith.constant dense<0xFF800000> : vector<8xf32>
    %261 = vector.multi_reduction <maximumf>, %245, %cst_68 [1] : vector<8x128xf32> to vector<8xf32>
    %262 = vector.shape_cast %261 : vector<8xf32> to vector<8x1xf32>
    %cst_69 = arith.constant -5.000000e+29 : f32
    %263 = vector.broadcast %cst_69 : f32 to vector<8x1xf32>
    %264 = arith.cmpf ogt, %262, %263 : vector<8x1xf32>
    %265 = vector.broadcast %262 : vector<8x1xf32> to vector<8x128xf32>
    %266 = arith.cmpf oeq, %245, %265 : vector<8x128xf32>
    %c128_i32_70 = arith.constant 128 : i32
    %267 = vector.broadcast %c128_i32_70 : i32 to vector<8x128xi32>
    %268 = arith.select %266, %260, %267 : vector<8x128xi1>, vector<8x128xi32>
    %cst_71 = arith.constant dense<2147483647> : vector<8xi32>
    %269 = vector.multi_reduction <minsi>, %268, %cst_71 [1] : vector<8x128xi32> to vector<8xi32>
    %270 = vector.shape_cast %269 : vector<8xi32> to vector<8x1xi32>
    %271 = vector.broadcast %270 : vector<8x1xi32> to vector<8x128xi32>
    %272 = arith.cmpi eq, %260, %271 : vector<8x128xi32>
    %cst_72 = arith.constant -1.000000e+30 : f32
    %273 = vector.broadcast %cst_72 : f32 to vector<8x128xf32>
    %274 = arith.select %272, %27, %273 : vector<8x128xi1>, vector<8x128xf32>
    %cst_73 = arith.constant dense<0xFF800000> : vector<8xf32>
    %275 = vector.multi_reduction <maximumf>, %274, %cst_73 [1] : vector<8x128xf32> to vector<8xf32>
    %276 = vector.shape_cast %275 : vector<8xf32> to vector<8x1xf32>
    %cst_74 = arith.constant -1.000000e+30 : f32
    %277 = vector.broadcast %cst_74 : f32 to vector<8x128xf32>
    %278 = arith.select %272, %31, %277 : vector<8x128xi1>, vector<8x128xf32>
    %cst_75 = arith.constant dense<0xFF800000> : vector<8xf32>
    %279 = vector.multi_reduction <maximumf>, %278, %cst_75 [1] : vector<8x128xf32> to vector<8xf32>
    %280 = vector.shape_cast %279 : vector<8xf32> to vector<8x1xf32>
    %281 = vector.broadcast %280 : vector<8x1xf32> to vector<8x128xf32>
    %282 = arith.minimumf %281, %31 : vector<8x128xf32>
    %283 = vector.broadcast %276 : vector<8x1xf32> to vector<8x128xf32>
    %284 = arith.maximumf %283, %27 : vector<8x128xf32>
    %285 = arith.subf %282, %284 : vector<8x128xf32>
    %cst_76 = arith.constant 0.000000e+00 : f32
    %286 = vector.broadcast %cst_76 : f32 to vector<8x128xf32>
    %287 = arith.maximumf %285, %286 : vector<8x128xf32>
    %288 = arith.subf %280, %276 : vector<8x1xf32>
    %289 = vector.broadcast %288 : vector<8x1xf32> to vector<8x128xf32>
    %290 = arith.addf %32, %289 : vector<8x128xf32>
    %291 = arith.subf %290, %287 : vector<8x128xf32>
    %cst_77 = arith.constant 5.000000e-01 : f32
    %292 = vector.broadcast %cst_77 : f32 to vector<8x128xf32>
    %293 = arith.mulf %292, %291 : vector<8x128xf32>
    %294 = arith.cmpf ogt, %287, %293 : vector<8x128xf32>
    %295 = arith.ori %294, %272 : vector<8x128xi1>
    %296 = vector.broadcast %264 : vector<8x1xi1> to vector<8x128xi1>
    %297 = arith.andi %295, %296 : vector<8x128xi1>
    %cst_78 = arith.constant -1.000000e+30 : f32
    %298 = vector.broadcast %cst_78 : f32 to vector<8x128xf32>
    %299 = arith.select %297, %298, %245 : vector<8x128xi1>, vector<8x128xf32>
    %300 = vector.broadcast %c4_i32 : i32 to vector<1x128xi32>
    %301 = arith.cmpi eq, %40, %300 : vector<1x128xi32>
    %302 = vector.broadcast %301 : vector<1x128xi1> to vector<8x128xi1>
    %303 = vector.broadcast %264 : vector<8x1xi1> to vector<8x128xi1>
    %304 = arith.andi %302, %303 : vector<8x128xi1>
    %305 = vector.shape_cast %276 : vector<8x1xf32> to vector<8x1xf32>
    %306 = vector.broadcast %305 : vector<8x1xf32> to vector<8x128xf32>
    %307 = arith.select %304, %306, %253 : vector<8x128xi1>, vector<8x128xf32>
    %308 = vector.shape_cast %280 : vector<8x1xf32> to vector<8x1xf32>
    %309 = vector.broadcast %308 : vector<8x1xf32> to vector<8x128xf32>
    %310 = arith.select %304, %309, %256 : vector<8x128xi1>, vector<8x128xf32>
    %311 = vector.shape_cast %262 : vector<8x1xf32> to vector<8x1xf32>
    %312 = vector.broadcast %311 : vector<8x1xf32> to vector<8x128xf32>
    %313 = arith.select %304, %312, %259 : vector<8x128xi1>, vector<8x128xf32>
    %c5_i32 = arith.constant 5 : i32
    %314 = tpu.iota {dimensions = array<i32: 1>} : vector<8x128xi32>
    %cst_79 = arith.constant dense<0xFF800000> : vector<8xf32>
    %315 = vector.multi_reduction <maximumf>, %299, %cst_79 [1] : vector<8x128xf32> to vector<8xf32>
    %316 = vector.shape_cast %315 : vector<8xf32> to vector<8x1xf32>
    %cst_80 = arith.constant -5.000000e+29 : f32
    %317 = vector.broadcast %cst_80 : f32 to vector<8x1xf32>
    %318 = arith.cmpf ogt, %316, %317 : vector<8x1xf32>
    %319 = vector.broadcast %316 : vector<8x1xf32> to vector<8x128xf32>
    %320 = arith.cmpf oeq, %299, %319 : vector<8x128xf32>
    %c128_i32_81 = arith.constant 128 : i32
    %321 = vector.broadcast %c128_i32_81 : i32 to vector<8x128xi32>
    %322 = arith.select %320, %314, %321 : vector<8x128xi1>, vector<8x128xi32>
    %cst_82 = arith.constant dense<2147483647> : vector<8xi32>
    %323 = vector.multi_reduction <minsi>, %322, %cst_82 [1] : vector<8x128xi32> to vector<8xi32>
    %324 = vector.shape_cast %323 : vector<8xi32> to vector<8x1xi32>
    %325 = vector.broadcast %324 : vector<8x1xi32> to vector<8x128xi32>
    %326 = arith.cmpi eq, %314, %325 : vector<8x128xi32>
    %cst_83 = arith.constant -1.000000e+30 : f32
    %327 = vector.broadcast %cst_83 : f32 to vector<8x128xf32>
    %328 = arith.select %326, %27, %327 : vector<8x128xi1>, vector<8x128xf32>
    %cst_84 = arith.constant dense<0xFF800000> : vector<8xf32>
    %329 = vector.multi_reduction <maximumf>, %328, %cst_84 [1] : vector<8x128xf32> to vector<8xf32>
    %330 = vector.shape_cast %329 : vector<8xf32> to vector<8x1xf32>
    %cst_85 = arith.constant -1.000000e+30 : f32
    %331 = vector.broadcast %cst_85 : f32 to vector<8x128xf32>
    %332 = arith.select %326, %31, %331 : vector<8x128xi1>, vector<8x128xf32>
    %cst_86 = arith.constant dense<0xFF800000> : vector<8xf32>
    %333 = vector.multi_reduction <maximumf>, %332, %cst_86 [1] : vector<8x128xf32> to vector<8xf32>
    %334 = vector.shape_cast %333 : vector<8xf32> to vector<8x1xf32>
    %335 = vector.broadcast %334 : vector<8x1xf32> to vector<8x128xf32>
    %336 = arith.minimumf %335, %31 : vector<8x128xf32>
    %337 = vector.broadcast %330 : vector<8x1xf32> to vector<8x128xf32>
    %338 = arith.maximumf %337, %27 : vector<8x128xf32>
    %339 = arith.subf %336, %338 : vector<8x128xf32>
    %cst_87 = arith.constant 0.000000e+00 : f32
    %340 = vector.broadcast %cst_87 : f32 to vector<8x128xf32>
    %341 = arith.maximumf %339, %340 : vector<8x128xf32>
    %342 = arith.subf %334, %330 : vector<8x1xf32>
    %343 = vector.broadcast %342 : vector<8x1xf32> to vector<8x128xf32>
    %344 = arith.addf %32, %343 : vector<8x128xf32>
    %345 = arith.subf %344, %341 : vector<8x128xf32>
    %cst_88 = arith.constant 5.000000e-01 : f32
    %346 = vector.broadcast %cst_88 : f32 to vector<8x128xf32>
    %347 = arith.mulf %346, %345 : vector<8x128xf32>
    %348 = arith.cmpf ogt, %341, %347 : vector<8x128xf32>
    %349 = arith.ori %348, %326 : vector<8x128xi1>
    %350 = vector.broadcast %318 : vector<8x1xi1> to vector<8x128xi1>
    %351 = arith.andi %349, %350 : vector<8x128xi1>
    %cst_89 = arith.constant -1.000000e+30 : f32
    %352 = vector.broadcast %cst_89 : f32 to vector<8x128xf32>
    %353 = arith.select %351, %352, %299 : vector<8x128xi1>, vector<8x128xf32>
    %354 = vector.broadcast %c5_i32 : i32 to vector<1x128xi32>
    %355 = arith.cmpi eq, %40, %354 : vector<1x128xi32>
    %356 = vector.broadcast %355 : vector<1x128xi1> to vector<8x128xi1>
    %357 = vector.broadcast %318 : vector<8x1xi1> to vector<8x128xi1>
    %358 = arith.andi %356, %357 : vector<8x128xi1>
    %359 = vector.shape_cast %330 : vector<8x1xf32> to vector<8x1xf32>
    %360 = vector.broadcast %359 : vector<8x1xf32> to vector<8x128xf32>
    %361 = arith.select %358, %360, %307 : vector<8x128xi1>, vector<8x128xf32>
    %362 = vector.shape_cast %334 : vector<8x1xf32> to vector<8x1xf32>
    %363 = vector.broadcast %362 : vector<8x1xf32> to vector<8x128xf32>
    %364 = arith.select %358, %363, %310 : vector<8x128xi1>, vector<8x128xf32>
    %365 = vector.shape_cast %316 : vector<8x1xf32> to vector<8x1xf32>
    %366 = vector.broadcast %365 : vector<8x1xf32> to vector<8x128xf32>
    %367 = arith.select %358, %366, %313 : vector<8x128xi1>, vector<8x128xf32>
    %c6_i32 = arith.constant 6 : i32
    %368 = tpu.iota {dimensions = array<i32: 1>} : vector<8x128xi32>
    %cst_90 = arith.constant dense<0xFF800000> : vector<8xf32>
    %369 = vector.multi_reduction <maximumf>, %353, %cst_90 [1] : vector<8x128xf32> to vector<8xf32>
    %370 = vector.shape_cast %369 : vector<8xf32> to vector<8x1xf32>
    %cst_91 = arith.constant -5.000000e+29 : f32
    %371 = vector.broadcast %cst_91 : f32 to vector<8x1xf32>
    %372 = arith.cmpf ogt, %370, %371 : vector<8x1xf32>
    %373 = vector.broadcast %370 : vector<8x1xf32> to vector<8x128xf32>
    %374 = arith.cmpf oeq, %353, %373 : vector<8x128xf32>
    %c128_i32_92 = arith.constant 128 : i32
    %375 = vector.broadcast %c128_i32_92 : i32 to vector<8x128xi32>
    %376 = arith.select %374, %368, %375 : vector<8x128xi1>, vector<8x128xi32>
    %cst_93 = arith.constant dense<2147483647> : vector<8xi32>
    %377 = vector.multi_reduction <minsi>, %376, %cst_93 [1] : vector<8x128xi32> to vector<8xi32>
    %378 = vector.shape_cast %377 : vector<8xi32> to vector<8x1xi32>
    %379 = vector.broadcast %378 : vector<8x1xi32> to vector<8x128xi32>
    %380 = arith.cmpi eq, %368, %379 : vector<8x128xi32>
    %cst_94 = arith.constant -1.000000e+30 : f32
    %381 = vector.broadcast %cst_94 : f32 to vector<8x128xf32>
    %382 = arith.select %380, %27, %381 : vector<8x128xi1>, vector<8x128xf32>
    %cst_95 = arith.constant dense<0xFF800000> : vector<8xf32>
    %383 = vector.multi_reduction <maximumf>, %382, %cst_95 [1] : vector<8x128xf32> to vector<8xf32>
    %384 = vector.shape_cast %383 : vector<8xf32> to vector<8x1xf32>
    %cst_96 = arith.constant -1.000000e+30 : f32
    %385 = vector.broadcast %cst_96 : f32 to vector<8x128xf32>
    %386 = arith.select %380, %31, %385 : vector<8x128xi1>, vector<8x128xf32>
    %cst_97 = arith.constant dense<0xFF800000> : vector<8xf32>
    %387 = vector.multi_reduction <maximumf>, %386, %cst_97 [1] : vector<8x128xf32> to vector<8xf32>
    %388 = vector.shape_cast %387 : vector<8xf32> to vector<8x1xf32>
    %389 = vector.broadcast %388 : vector<8x1xf32> to vector<8x128xf32>
    %390 = arith.minimumf %389, %31 : vector<8x128xf32>
    %391 = vector.broadcast %384 : vector<8x1xf32> to vector<8x128xf32>
    %392 = arith.maximumf %391, %27 : vector<8x128xf32>
    %393 = arith.subf %390, %392 : vector<8x128xf32>
    %cst_98 = arith.constant 0.000000e+00 : f32
    %394 = vector.broadcast %cst_98 : f32 to vector<8x128xf32>
    %395 = arith.maximumf %393, %394 : vector<8x128xf32>
    %396 = arith.subf %388, %384 : vector<8x1xf32>
    %397 = vector.broadcast %396 : vector<8x1xf32> to vector<8x128xf32>
    %398 = arith.addf %32, %397 : vector<8x128xf32>
    %399 = arith.subf %398, %395 : vector<8x128xf32>
    %cst_99 = arith.constant 5.000000e-01 : f32
    %400 = vector.broadcast %cst_99 : f32 to vector<8x128xf32>
    %401 = arith.mulf %400, %399 : vector<8x128xf32>
    %402 = arith.cmpf ogt, %395, %401 : vector<8x128xf32>
    %403 = arith.ori %402, %380 : vector<8x128xi1>
    %404 = vector.broadcast %372 : vector<8x1xi1> to vector<8x128xi1>
    %405 = arith.andi %403, %404 : vector<8x128xi1>
    %cst_100 = arith.constant -1.000000e+30 : f32
    %406 = vector.broadcast %cst_100 : f32 to vector<8x128xf32>
    %407 = arith.select %405, %406, %353 : vector<8x128xi1>, vector<8x128xf32>
    %408 = vector.broadcast %c6_i32 : i32 to vector<1x128xi32>
    %409 = arith.cmpi eq, %40, %408 : vector<1x128xi32>
    %410 = vector.broadcast %409 : vector<1x128xi1> to vector<8x128xi1>
    %411 = vector.broadcast %372 : vector<8x1xi1> to vector<8x128xi1>
    %412 = arith.andi %410, %411 : vector<8x128xi1>
    %413 = vector.shape_cast %384 : vector<8x1xf32> to vector<8x1xf32>
    %414 = vector.broadcast %413 : vector<8x1xf32> to vector<8x128xf32>
    %415 = arith.select %412, %414, %361 : vector<8x128xi1>, vector<8x128xf32>
    %416 = vector.shape_cast %388 : vector<8x1xf32> to vector<8x1xf32>
    %417 = vector.broadcast %416 : vector<8x1xf32> to vector<8x128xf32>
    %418 = arith.select %412, %417, %364 : vector<8x128xi1>, vector<8x128xf32>
    %419 = vector.shape_cast %370 : vector<8x1xf32> to vector<8x1xf32>
    %420 = vector.broadcast %419 : vector<8x1xf32> to vector<8x128xf32>
    %421 = arith.select %412, %420, %367 : vector<8x128xi1>, vector<8x128xf32>
    %c7_i32 = arith.constant 7 : i32
    %422 = tpu.iota {dimensions = array<i32: 1>} : vector<8x128xi32>
    %cst_101 = arith.constant dense<0xFF800000> : vector<8xf32>
    %423 = vector.multi_reduction <maximumf>, %407, %cst_101 [1] : vector<8x128xf32> to vector<8xf32>
    %424 = vector.shape_cast %423 : vector<8xf32> to vector<8x1xf32>
    %cst_102 = arith.constant -5.000000e+29 : f32
    %425 = vector.broadcast %cst_102 : f32 to vector<8x1xf32>
    %426 = arith.cmpf ogt, %424, %425 : vector<8x1xf32>
    %427 = vector.broadcast %424 : vector<8x1xf32> to vector<8x128xf32>
    %428 = arith.cmpf oeq, %407, %427 : vector<8x128xf32>
    %c128_i32_103 = arith.constant 128 : i32
    %429 = vector.broadcast %c128_i32_103 : i32 to vector<8x128xi32>
    %430 = arith.select %428, %422, %429 : vector<8x128xi1>, vector<8x128xi32>
    %cst_104 = arith.constant dense<2147483647> : vector<8xi32>
    %431 = vector.multi_reduction <minsi>, %430, %cst_104 [1] : vector<8x128xi32> to vector<8xi32>
    %432 = vector.shape_cast %431 : vector<8xi32> to vector<8x1xi32>
    %433 = vector.broadcast %432 : vector<8x1xi32> to vector<8x128xi32>
    %434 = arith.cmpi eq, %422, %433 : vector<8x128xi32>
    %cst_105 = arith.constant -1.000000e+30 : f32
    %435 = vector.broadcast %cst_105 : f32 to vector<8x128xf32>
    %436 = arith.select %434, %27, %435 : vector<8x128xi1>, vector<8x128xf32>
    %cst_106 = arith.constant dense<0xFF800000> : vector<8xf32>
    %437 = vector.multi_reduction <maximumf>, %436, %cst_106 [1] : vector<8x128xf32> to vector<8xf32>
    %438 = vector.shape_cast %437 : vector<8xf32> to vector<8x1xf32>
    %cst_107 = arith.constant -1.000000e+30 : f32
    %439 = vector.broadcast %cst_107 : f32 to vector<8x128xf32>
    %440 = arith.select %434, %31, %439 : vector<8x128xi1>, vector<8x128xf32>
    %cst_108 = arith.constant dense<0xFF800000> : vector<8xf32>
    %441 = vector.multi_reduction <maximumf>, %440, %cst_108 [1] : vector<8x128xf32> to vector<8xf32>
    %442 = vector.shape_cast %441 : vector<8xf32> to vector<8x1xf32>
    %443 = vector.broadcast %442 : vector<8x1xf32> to vector<8x128xf32>
    %444 = arith.minimumf %443, %31 : vector<8x128xf32>
    %445 = vector.broadcast %438 : vector<8x1xf32> to vector<8x128xf32>
    %446 = arith.maximumf %445, %27 : vector<8x128xf32>
    %447 = arith.subf %444, %446 : vector<8x128xf32>
    %cst_109 = arith.constant 0.000000e+00 : f32
    %448 = vector.broadcast %cst_109 : f32 to vector<8x128xf32>
    %449 = arith.maximumf %447, %448 : vector<8x128xf32>
    %450 = arith.subf %442, %438 : vector<8x1xf32>
    %451 = vector.broadcast %450 : vector<8x1xf32> to vector<8x128xf32>
    %452 = arith.addf %32, %451 : vector<8x128xf32>
    %453 = arith.subf %452, %449 : vector<8x128xf32>
    %cst_110 = arith.constant 5.000000e-01 : f32
    %454 = vector.broadcast %cst_110 : f32 to vector<8x128xf32>
    %455 = arith.mulf %454, %453 : vector<8x128xf32>
    %456 = arith.cmpf ogt, %449, %455 : vector<8x128xf32>
    %457 = arith.ori %456, %434 : vector<8x128xi1>
    %458 = vector.broadcast %426 : vector<8x1xi1> to vector<8x128xi1>
    %459 = arith.andi %457, %458 : vector<8x128xi1>
    %cst_111 = arith.constant -1.000000e+30 : f32
    %460 = vector.broadcast %cst_111 : f32 to vector<8x128xf32>
    %461 = arith.select %459, %460, %407 : vector<8x128xi1>, vector<8x128xf32>
    %462 = vector.broadcast %c7_i32 : i32 to vector<1x128xi32>
    %463 = arith.cmpi eq, %40, %462 : vector<1x128xi32>
    %464 = vector.broadcast %463 : vector<1x128xi1> to vector<8x128xi1>
    %465 = vector.broadcast %426 : vector<8x1xi1> to vector<8x128xi1>
    %466 = arith.andi %464, %465 : vector<8x128xi1>
    %467 = vector.shape_cast %438 : vector<8x1xf32> to vector<8x1xf32>
    %468 = vector.broadcast %467 : vector<8x1xf32> to vector<8x128xf32>
    %469 = arith.select %466, %468, %415 : vector<8x128xi1>, vector<8x128xf32>
    %470 = vector.shape_cast %442 : vector<8x1xf32> to vector<8x1xf32>
    %471 = vector.broadcast %470 : vector<8x1xf32> to vector<8x128xf32>
    %472 = arith.select %466, %471, %418 : vector<8x128xi1>, vector<8x128xf32>
    %473 = vector.shape_cast %424 : vector<8x1xf32> to vector<8x1xf32>
    %474 = vector.broadcast %473 : vector<8x1xf32> to vector<8x128xf32>
    %475 = arith.select %466, %474, %421 : vector<8x128xi1>, vector<8x128xf32>
    %c8_i32 = arith.constant 8 : i32
    %476 = tpu.iota {dimensions = array<i32: 1>} : vector<8x128xi32>
    %cst_112 = arith.constant dense<0xFF800000> : vector<8xf32>
    %477 = vector.multi_reduction <maximumf>, %461, %cst_112 [1] : vector<8x128xf32> to vector<8xf32>
    %478 = vector.shape_cast %477 : vector<8xf32> to vector<8x1xf32>
    %cst_113 = arith.constant -5.000000e+29 : f32
    %479 = vector.broadcast %cst_113 : f32 to vector<8x1xf32>
    %480 = arith.cmpf ogt, %478, %479 : vector<8x1xf32>
    %481 = vector.broadcast %478 : vector<8x1xf32> to vector<8x128xf32>
    %482 = arith.cmpf oeq, %461, %481 : vector<8x128xf32>
    %c128_i32_114 = arith.constant 128 : i32
    %483 = vector.broadcast %c128_i32_114 : i32 to vector<8x128xi32>
    %484 = arith.select %482, %476, %483 : vector<8x128xi1>, vector<8x128xi32>
    %cst_115 = arith.constant dense<2147483647> : vector<8xi32>
    %485 = vector.multi_reduction <minsi>, %484, %cst_115 [1] : vector<8x128xi32> to vector<8xi32>
    %486 = vector.shape_cast %485 : vector<8xi32> to vector<8x1xi32>
    %487 = vector.broadcast %486 : vector<8x1xi32> to vector<8x128xi32>
    %488 = arith.cmpi eq, %476, %487 : vector<8x128xi32>
    %cst_116 = arith.constant -1.000000e+30 : f32
    %489 = vector.broadcast %cst_116 : f32 to vector<8x128xf32>
    %490 = arith.select %488, %27, %489 : vector<8x128xi1>, vector<8x128xf32>
    %cst_117 = arith.constant dense<0xFF800000> : vector<8xf32>
    %491 = vector.multi_reduction <maximumf>, %490, %cst_117 [1] : vector<8x128xf32> to vector<8xf32>
    %492 = vector.shape_cast %491 : vector<8xf32> to vector<8x1xf32>
    %cst_118 = arith.constant -1.000000e+30 : f32
    %493 = vector.broadcast %cst_118 : f32 to vector<8x128xf32>
    %494 = arith.select %488, %31, %493 : vector<8x128xi1>, vector<8x128xf32>
    %cst_119 = arith.constant dense<0xFF800000> : vector<8xf32>
    %495 = vector.multi_reduction <maximumf>, %494, %cst_119 [1] : vector<8x128xf32> to vector<8xf32>
    %496 = vector.shape_cast %495 : vector<8xf32> to vector<8x1xf32>
    %497 = vector.broadcast %496 : vector<8x1xf32> to vector<8x128xf32>
    %498 = arith.minimumf %497, %31 : vector<8x128xf32>
    %499 = vector.broadcast %492 : vector<8x1xf32> to vector<8x128xf32>
    %500 = arith.maximumf %499, %27 : vector<8x128xf32>
    %501 = arith.subf %498, %500 : vector<8x128xf32>
    %cst_120 = arith.constant 0.000000e+00 : f32
    %502 = vector.broadcast %cst_120 : f32 to vector<8x128xf32>
    %503 = arith.maximumf %501, %502 : vector<8x128xf32>
    %504 = arith.subf %496, %492 : vector<8x1xf32>
    %505 = vector.broadcast %504 : vector<8x1xf32> to vector<8x128xf32>
    %506 = arith.addf %32, %505 : vector<8x128xf32>
    %507 = arith.subf %506, %503 : vector<8x128xf32>
    %cst_121 = arith.constant 5.000000e-01 : f32
    %508 = vector.broadcast %cst_121 : f32 to vector<8x128xf32>
    %509 = arith.mulf %508, %507 : vector<8x128xf32>
    %510 = arith.cmpf ogt, %503, %509 : vector<8x128xf32>
    %511 = arith.ori %510, %488 : vector<8x128xi1>
    %512 = vector.broadcast %480 : vector<8x1xi1> to vector<8x128xi1>
    %513 = arith.andi %511, %512 : vector<8x128xi1>
    %cst_122 = arith.constant -1.000000e+30 : f32
    %514 = vector.broadcast %cst_122 : f32 to vector<8x128xf32>
    %515 = arith.select %513, %514, %461 : vector<8x128xi1>, vector<8x128xf32>
    %516 = vector.broadcast %c8_i32 : i32 to vector<1x128xi32>
    %517 = arith.cmpi eq, %40, %516 : vector<1x128xi32>
    %518 = vector.broadcast %517 : vector<1x128xi1> to vector<8x128xi1>
    %519 = vector.broadcast %480 : vector<8x1xi1> to vector<8x128xi1>
    %520 = arith.andi %518, %519 : vector<8x128xi1>
    %521 = vector.shape_cast %492 : vector<8x1xf32> to vector<8x1xf32>
    %522 = vector.broadcast %521 : vector<8x1xf32> to vector<8x128xf32>
    %523 = arith.select %520, %522, %469 : vector<8x128xi1>, vector<8x128xf32>
    %524 = vector.shape_cast %496 : vector<8x1xf32> to vector<8x1xf32>
    %525 = vector.broadcast %524 : vector<8x1xf32> to vector<8x128xf32>
    %526 = arith.select %520, %525, %472 : vector<8x128xi1>, vector<8x128xf32>
    %527 = vector.shape_cast %478 : vector<8x1xf32> to vector<8x1xf32>
    %528 = vector.broadcast %527 : vector<8x1xf32> to vector<8x128xf32>
    %529 = arith.select %520, %528, %475 : vector<8x128xi1>, vector<8x128xf32>
    %c9_i32 = arith.constant 9 : i32
    %530 = tpu.iota {dimensions = array<i32: 1>} : vector<8x128xi32>
    %cst_123 = arith.constant dense<0xFF800000> : vector<8xf32>
    %531 = vector.multi_reduction <maximumf>, %515, %cst_123 [1] : vector<8x128xf32> to vector<8xf32>
    %532 = vector.shape_cast %531 : vector<8xf32> to vector<8x1xf32>
    %cst_124 = arith.constant -5.000000e+29 : f32
    %533 = vector.broadcast %cst_124 : f32 to vector<8x1xf32>
    %534 = arith.cmpf ogt, %532, %533 : vector<8x1xf32>
    %535 = vector.broadcast %532 : vector<8x1xf32> to vector<8x128xf32>
    %536 = arith.cmpf oeq, %515, %535 : vector<8x128xf32>
    %c128_i32_125 = arith.constant 128 : i32
    %537 = vector.broadcast %c128_i32_125 : i32 to vector<8x128xi32>
    %538 = arith.select %536, %530, %537 : vector<8x128xi1>, vector<8x128xi32>
    %cst_126 = arith.constant dense<2147483647> : vector<8xi32>
    %539 = vector.multi_reduction <minsi>, %538, %cst_126 [1] : vector<8x128xi32> to vector<8xi32>
    %540 = vector.shape_cast %539 : vector<8xi32> to vector<8x1xi32>
    %541 = vector.broadcast %540 : vector<8x1xi32> to vector<8x128xi32>
    %542 = arith.cmpi eq, %530, %541 : vector<8x128xi32>
    %cst_127 = arith.constant -1.000000e+30 : f32
    %543 = vector.broadcast %cst_127 : f32 to vector<8x128xf32>
    %544 = arith.select %542, %27, %543 : vector<8x128xi1>, vector<8x128xf32>
    %cst_128 = arith.constant dense<0xFF800000> : vector<8xf32>
    %545 = vector.multi_reduction <maximumf>, %544, %cst_128 [1] : vector<8x128xf32> to vector<8xf32>
    %546 = vector.shape_cast %545 : vector<8xf32> to vector<8x1xf32>
    %cst_129 = arith.constant -1.000000e+30 : f32
    %547 = vector.broadcast %cst_129 : f32 to vector<8x128xf32>
    %548 = arith.select %542, %31, %547 : vector<8x128xi1>, vector<8x128xf32>
    %cst_130 = arith.constant dense<0xFF800000> : vector<8xf32>
    %549 = vector.multi_reduction <maximumf>, %548, %cst_130 [1] : vector<8x128xf32> to vector<8xf32>
    %550 = vector.shape_cast %549 : vector<8xf32> to vector<8x1xf32>
    %551 = vector.broadcast %550 : vector<8x1xf32> to vector<8x128xf32>
    %552 = arith.minimumf %551, %31 : vector<8x128xf32>
    %553 = vector.broadcast %546 : vector<8x1xf32> to vector<8x128xf32>
    %554 = arith.maximumf %553, %27 : vector<8x128xf32>
    %555 = arith.subf %552, %554 : vector<8x128xf32>
    %cst_131 = arith.constant 0.000000e+00 : f32
    %556 = vector.broadcast %cst_131 : f32 to vector<8x128xf32>
    %557 = arith.maximumf %555, %556 : vector<8x128xf32>
    %558 = arith.subf %550, %546 : vector<8x1xf32>
    %559 = vector.broadcast %558 : vector<8x1xf32> to vector<8x128xf32>
    %560 = arith.addf %32, %559 : vector<8x128xf32>
    %561 = arith.subf %560, %557 : vector<8x128xf32>
    %cst_132 = arith.constant 5.000000e-01 : f32
    %562 = vector.broadcast %cst_132 : f32 to vector<8x128xf32>
    %563 = arith.mulf %562, %561 : vector<8x128xf32>
    %564 = arith.cmpf ogt, %557, %563 : vector<8x128xf32>
    %565 = arith.ori %564, %542 : vector<8x128xi1>
    %566 = vector.broadcast %534 : vector<8x1xi1> to vector<8x128xi1>
    %567 = arith.andi %565, %566 : vector<8x128xi1>
    %cst_133 = arith.constant -1.000000e+30 : f32
    %568 = vector.broadcast %cst_133 : f32 to vector<8x128xf32>
    %569 = arith.select %567, %568, %515 : vector<8x128xi1>, vector<8x128xf32>
    %570 = vector.broadcast %c9_i32 : i32 to vector<1x128xi32>
    %571 = arith.cmpi eq, %40, %570 : vector<1x128xi32>
    %572 = vector.broadcast %571 : vector<1x128xi1> to vector<8x128xi1>
    %573 = vector.broadcast %534 : vector<8x1xi1> to vector<8x128xi1>
    %574 = arith.andi %572, %573 : vector<8x128xi1>
    %575 = vector.shape_cast %546 : vector<8x1xf32> to vector<8x1xf32>
    %576 = vector.broadcast %575 : vector<8x1xf32> to vector<8x128xf32>
    %577 = arith.select %574, %576, %523 : vector<8x128xi1>, vector<8x128xf32>
    %578 = vector.shape_cast %550 : vector<8x1xf32> to vector<8x1xf32>
    %579 = vector.broadcast %578 : vector<8x1xf32> to vector<8x128xf32>
    %580 = arith.select %574, %579, %526 : vector<8x128xi1>, vector<8x128xf32>
    %581 = vector.shape_cast %532 : vector<8x1xf32> to vector<8x1xf32>
    %582 = vector.broadcast %581 : vector<8x1xf32> to vector<8x128xf32>
    %583 = arith.select %574, %582, %529 : vector<8x128xi1>, vector<8x128xf32>
    %c10_i32 = arith.constant 10 : i32
    %c0_134 = arith.constant 0 : index
    %c0_135 = arith.constant 0 : index
    %584 = vector.load %arg4[%c0_134, %c0_135] : memref<8x384xf32, #tpu.memory_space<vmem>>, vector<8x128xf32>
    tpu.vector_store %arg4[%c0_134, %c0_135], %577 {strides = array<i32>} : memref<8x384xf32, #tpu.memory_space<vmem>>, vector<8x128xf32>,
    %c0_136 = arith.constant 0 : index
    %c128 = arith.constant 128 : index
    %585 = vector.load %arg4[%c0_136, %c128] : memref<8x384xf32, #tpu.memory_space<vmem>>, vector<8x128xf32>
    tpu.vector_store %arg4[%c0_136, %c128], %580 {strides = array<i32>} : memref<8x384xf32, #tpu.memory_space<vmem>>, vector<8x128xf32>,
    %c0_137 = arith.constant 0 : index
    %c256 = arith.constant 256 : index
    %586 = vector.load %arg4[%c0_137, %c256] : memref<8x384xf32, #tpu.memory_space<vmem>>, vector<8x128xf32>
    tpu.vector_store %arg4[%c0_137, %c256], %583 {strides = array<i32>} : memref<8x384xf32, #tpu.memory_space<vmem>>, vector<8x128xf32>,
    return
  }
  func.func @transform_0(%arg0: i32) -> (i32, i32, i32) {
    %c0_i32 = arith.constant 0 : i32
    %c0_i32_0 = arith.constant 0 : i32
    %c0_i32_1 = arith.constant 0 : i32
    return %c0_i32, %arg0, %c0_i32_0 : i32, i32, i32
  }
  func.func @transform_1(%arg0: i32) -> (i32, i32, i32) {
    %c0_i32 = arith.constant 0 : i32
    %c0_i32_0 = arith.constant 0 : i32
    %c0_i32_1 = arith.constant 0 : i32
    return %c0_i32, %arg0, %c0_i32_0 : i32, i32, i32
  }
  func.func @transform_2(%arg0: i32) -> (i32, i32, i32) {
    %c0_i32 = arith.constant 0 : i32
    %c0_i32_0 = arith.constant 0 : i32
    %c0_i32_1 = arith.constant 0 : i32
    return %c0_i32, %arg0, %c0_i32_0 : i32, i32, i32
  }
  func.func @transform_3(%arg0: i32) -> (i32, i32) {
    %c0_i32 = arith.constant 0 : i32
    %c0_i32_0 = arith.constant 0 : i32
    return %arg0, %c0_i32 : i32, i32
  }
}

</mosaic_0001>

<bundles_post_ra>
// kernel: tpu_custom_call.1
= control target key start
LH: loop header
LB: loop body
LE: loop exit
PB: predicated region body
PF: predicated region fallthrough
CT: control target
= control target key end

     0   :  { %8 = vsyncpa [#allocation3], 0  ;;  %s1129_s0 = inlined_call_operand.hbm [shape: f32[2,8,128], index: 0, kind: input, shape index: {}]   ;;  %s1130_s1 = inlined_call_operand.hbm [shape: f32[2,8,128], index: 1, kind: input, shape index: {}]   ;;  %s1131_s2 = inlined_call_operand.hbm [shape: f32[1,8,128], index: 2, kind: input, shape index: {}]   ;;  %s1132_s3 = inlined_call_operand.hbm [shape: f32[8,384], index: 3, kind: output, shape index: {}]  }
   0x1   :  { %9 = vsyncpa [#allocation6], 0 }
   0x2   :  { %10 = vsyncpa [#allocation4], 0  ;;  %s28_s14 = sshll.u32 %s1130_s1, 4  ;;  %s678_s15 = smov [#allocation5]   ;;  %s29_s14 = int_to_ptr.hbm [resolvable:$true] %s28_s14 }
   0x3   :  { %s30_s16 = sshll.u32 %s678_s15, 4  ;;  %s15_s19 = sshll.u32 %s1129_s0, 4  ;;  %s31_s16 = int_to_ptr.vmem [resolvable:$true] %s30_s16  ;;  %s16_s19 = int_to_ptr.hbm [resolvable:$true] %s15_s19 }
   0x4   :  { %s679_s20 = smov 128   ;;  %s680_s21 = smov 8  }
   0x5   :  { %36 = dma.hbm_to_vmem [thread:$0]  %s29_s14, 256, %s31_s16, [#allocation6], %s679_s20, %s679_s20, %s680_s21  }
   0x6   :  { %s681_s22 = smov [#allocation2]   ;;  %s42_s26 = sshll.u32 %s1131_s2, 4  ;;  %s43_s26 = int_to_ptr.hbm [resolvable:$true] %s42_s26 }
   0x7   :  { %s17_s23 = sshll.u32 %s681_s22, 4  ;;  %s682_s1 = smov [#allocation7]   ;;  %s18_s23 = int_to_ptr.vmem [resolvable:$true] %s17_s23 }
   0x8   :  { %23 = dma.hbm_to_vmem [thread:$0]  %s16_s19, 256, %s18_s23, [#allocation3], %s679_s20, %s679_s20, %s680_s21  }
   0x9   :  { %s44_s27 = sshll.u32 %s682_s1, 4  ;;  %s45_s27 = int_to_ptr.vmem [resolvable:$true] %s44_s27 }
   0xa   :  { %47 = dma.hbm_to_vmem [thread:$0]  %s43_s26, 128, %s45_s27, [#allocation6]  }
   0xb   :  { %672 = dma.done.wait [#allocation3], 256  }
   0xc   :  { %673 = vsyncadd [#allocation3], 4294967040 }
   0xd   :  { %674 = dma.done.wait [#allocation6], 384  }
   0xe   :  { %675 = vsyncadd [#allocation6], 4294966912  ;;  %v60_v0 = vld [vmem:[#allocation2] sm:$0xff]  ;;  %v62_v1 = vld [vmem:[#allocation2 + $0x8] sm:$0xff]  ;;  %v87_v22 = vlaneseq  ;;  %s683_s0 = smov [#allocation8]   ;;  %s557_s30 = sshll.u32 %s1132_s3, 4  ;;  %s558_s30 = int_to_ptr.hbm [resolvable:$true] %s557_s30 }
   0xf   :  { %v65_v2 = vld [vmem:[#allocation5 + $0x8] sm:$0xff]  ;;  %v67_v3 = vsub.f32 %v62_v1, %v60_v0  ;;  %v63_v6 = vld [vmem:[#allocation5] sm:$0xff]  ;;  %v66_v17 = vld [vmem:[#allocation7] sm:$0xff]  ;;  %s555_s2 = sshll.u32 %s683_s0, 4  ;;  %s556_s2 = int_to_ptr.vmem [resolvable:$true] %s555_s2 }
  0x10   :  { %v72_v4 = vmul.f32 1.442695, %v65_v2  ;;  %vm83_vm0 = vcmp.gt.f32.partialorder %v66_v17, 0.01  ;;  %v722_v23 = vand.u32 127, %v87_v22 }
  0x11   :  { %v68_v5 = vmul.f32 0.5, %v67_v3  ;;  %v70_v8 = vmul.f32 %v67_v3, %v63_v6 }
  0x12   :  { %574 = vpow2.f32 %v72_v4 }
  0x13   :  { %v69_v7 = vadd.f32 %v68_v5, %v60_v0 }
  0x15   :  { %v71_v10 = vadd.f32 %v70_v8, %v69_v7 }
  0x18   :  { %v575_v9 = vpop.eup %574 }
  0x19   :  { %v74_v11 = vmul.f32 %v575_v9, %v67_v3 }
  0x1b   :  { %v75_v12 = vmul.f32 0.5, %v74_v11 }
  0x1d   :  { %v76_v13 = vsub.f32 %v71_v10, %v75_v12  ;;  %v77_v14 = vadd.f32 %v75_v12, %v71_v10 }
  0x1f   :  { %v78_v15 = vmax.f32 %v76_v13, 0.0  ;;  %v80_v16 = vmax.f32 %v77_v14, 0.0 }
  0x21   :  { %v713_v18 = vmin.f32 %v78_v15, 416.0  ;;  %v715_v19 = vmin.f32 %v80_v16, 416.0 }
  0x23   :  { %v719_v20 = vsub.f32 %v715_v19, %v713_v18 }
  0x25   :  { %vm84_vm1 = vcmp.gt.f32.partialorder %v719_v20, 3.0 }
  0x26   :  { %vm85_vm2 = vmand %vm83_vm0, %vm84_vm1 }
  0x27   :  { %v86_v21 = vsel %vm85_vm2, %v66_v17, -1e+30 }
  0x28   :  { %89 = vmax.xlane.f32.xlu0 %v86_v21 }
  0x9b   :  { %v724_v24 = vpop.xlane.xlu0 %89 }
  0x9c   :  { %vm92_vm3 = vcmp.eq.f32.partialorder %v86_v21, %v724_v24  ;;  %vm91_vm7 = vcmp.gt.f32.partialorder %v724_v24, -5e+29 }
  0x9d   :  { %v93_v25 = vsel %vm92_vm3, %v722_v23, 128 }
  0x9e   :  { %v95_v26 = vshra.s32 %v93_v25, 16  ;;  %v94_v28 = vand.u32 65535, %v93_v25 }
  0xa0   :  { %v97_v27 = vcvt.s32.f32 %v95_v26  ;;  %v96_v30 = vcvt.s32.f32 %v94_v28 }
  0xa2   :  { %98 = vmin.xlane.f32.xlu0 %v97_v27 }
 0x115   :  { %v99_v29 = vpop.xlane.xlu0 %98 }
 0x116   :  { %vm100_vm4 = vcmp.eq.f32.partialorder %v97_v27, %v99_v29  ;;  %v105_v32 = vcvt.f32.s32 %v99_v29 }
 0x117   :  { %v101_v31 = vsel %vm100_vm4, %v96_v30, inf }
 0x118   :  { %102 = vmin.xlane.f32.xlu1 %v101_v31  ;;  %v106_v34 = vshll.u32 %v105_v32, 16 }
 0x18b   :  { %v103_v33 = vpop.xlane.xlu1 %102 }
 0x18c   :  { %v104_v35 = vcvt.f32.s32 %v103_v33 }
 0x18e   :  { %v107_v36 = vadd.s32 %v106_v34, %v104_v35 }
 0x190   :  { %vm108_vm5 = vcmp.eq.s32.totalorder %v722_v23, %v107_v36 }
 0x191   :  { %v112_v37 = vsel %vm108_vm5, %v715_v19, -1e+30  ;;  %v109_v38 = vsel %vm108_vm5, %v713_v18, -1e+30 }
 0x192   :  { %113 = vmax.xlane.f32.xlu2 %v112_v37  ;;  %110 = vmax.xlane.f32.xlu1 %v109_v38 }
 0x205   :  { %v735_v39 = vpop.xlane.xlu2 %113  ;;  %v737_v40 = vpop.xlane.xlu1 %110 }
 0x206   :  { %v115_v41 = vmin.f32 %v735_v39, %v715_v19  ;;  %v116_v42 = vmax.f32 %v737_v40, %v713_v18  ;;  %v119_v43 = vsub.f32 %v735_v39, %v737_v40 }
 0x208   :  { %v117_v44 = vsub.f32 %v115_v41, %v116_v42  ;;  %v120_v46 = vadd.f32 %v119_v43, %v719_v20 }
 0x20a   :  { %v118_v45 = vmax.f32 %v117_v44, 0.0 }
 0x20c   :  { %v121_v47 = vsub.f32 %v120_v46, %v118_v45 }
 0x20e   :  { %v122_v48 = vmul.f32 0.5, %v121_v47 }
 0x210   :  { %vm123_vm6 = vcmp.gt.f32.partialorder %v118_v45, %v122_v48 }
 0x211   :  { %vm124_vm8 = vmor %vm123_vm6, %vm108_vm5 }
 0x212   :  { %vm127_vm9 = vmand %vm124_vm8, %vm91_vm7 }
 0x213   :  { %v128_v49 = vsel %vm127_vm9, -1e+30, %v86_v21 }
 0x214   :  { %136 = vmax.xlane.f32.xlu2 %v128_v49 }
 0x287   :  { %v751_v50 = vpop.xlane.xlu2 %136 }
 0x288   :  { %vm139_vm10 = vcmp.eq.f32.partialorder %v128_v49, %v751_v50  ;;  %vm138_vm14 = vcmp.gt.f32.partialorder %v751_v50, -5e+29 }
 0x289   :  { %v140_v51 = vsel %vm139_vm10, %v722_v23, 128 }
 0x28a   :  { %v142_v52 = vshra.s32 %v140_v51, 16  ;;  %v141_v54 = vand.u32 65535, %v140_v51 }
 0x28c   :  { %v144_v53 = vcvt.s32.f32 %v142_v52  ;;  %v143_v56 = vcvt.s32.f32 %v141_v54 }
 0x28e   :  { %145 = vmin.xlane.f32.xlu0 %v144_v53 }
 0x301   :  { %v146_v55 = vpop.xlane.xlu0 %145 }
 0x302   :  { %vm147_vm11 = vcmp.eq.f32.partialorder %v144_v53, %v146_v55  ;;  %v152_v58 = vcvt.f32.s32 %v146_v55 }
 0x303   :  { %v148_v57 = vsel %vm147_vm11, %v143_v56, inf }
 0x304   :  { %149 = vmin.xlane.f32.xlu1 %v148_v57  ;;  %v153_v60 = vshll.u32 %v152_v58, 16 }
 0x377   :  { %v150_v59 = vpop.xlane.xlu1 %149 }
 0x378   :  { %v151_v61 = vcvt.f32.s32 %v150_v59 }
 0x37a   :  { %v154_v62 = vadd.s32 %v153_v60, %v151_v61 }
 0x37c   :  { %vm155_vm12 = vcmp.eq.s32.totalorder %v722_v23, %v154_v62 }
 0x37d   :  { %v159_v63 = vsel %vm155_vm12, %v715_v19, -1e+30  ;;  %v156_v0 = vsel %vm155_vm12, %v713_v18, -1e+30 }
 0x37e   :  { %160 = vmax.xlane.f32.xlu0 %v159_v63  ;;  %157 = vmax.xlane.f32.xlu2 %v156_v0 }
 0x3f1   :  { %v762_v1 = vpop.xlane.xlu0 %160  ;;  %v764_v2 = vpop.xlane.xlu2 %157 }
 0x3f2   :  { %v162_v3 = vmin.f32 %v762_v1, %v715_v19  ;;  %v163_v4 = vmax.f32 %v764_v2, %v713_v18  ;;  %v166_v5 = vsub.f32 %v762_v1, %v764_v2 }
 0x3f4   :  { %v164_v6 = vsub.f32 %v162_v3, %v163_v4  ;;  %v167_v8 = vadd.f32 %v166_v5, %v719_v20 }
 0x3f6   :  { %v165_v7 = vmax.f32 %v164_v6, 0.0 }
 0x3f8   :  { %v168_v9 = vsub.f32 %v167_v8, %v165_v7 }
 0x3fa   :  { %v169_v10 = vmul.f32 0.5, %v168_v9 }
 0x3fc   :  { %vm170_vm13 = vcmp.gt.f32.partialorder %v165_v7, %v169_v10 }
 0x3fd   :  { %vm171_vm15 = vmor %vm170_vm13, %vm155_vm12 }
 0x3fe   :  { %vm174_vm0 = vmand %vm171_vm15, %vm138_vm14 }
 0x3ff   :  { %v175_v11 = vsel %vm174_vm0, -1e+30, %v128_v49 }
 0x400   :  { %183 = vmax.xlane.f32.xlu1 %v175_v11 }
 0x473   :  { %v778_v12 = vpop.xlane.xlu1 %183 }
 0x474   :  { %vm186_vm1 = vcmp.eq.f32.partialorder %v175_v11, %v778_v12  ;;  %vm185_vm5 = vcmp.gt.f32.partialorder %v778_v12, -5e+29 }
 0x475   :  { %v187_v13 = vsel %vm186_vm1, %v722_v23, 128 }
 0x476   :  { %v189_v14 = vshra.s32 %v187_v13, 16  ;;  %v188_v16 = vand.u32 65535, %v187_v13 }
 0x478   :  { %v191_v15 = vcvt.s32.f32 %v189_v14  ;;  %v190_v21 = vcvt.s32.f32 %v188_v16 }
 0x47a   :  { %192 = vmin.xlane.f32.xlu2 %v191_v15 }
 0x4ed   :  { %v193_v17 = vpop.xlane.xlu2 %192 }
 0x4ee   :  { %vm194_vm2 = vcmp.eq.f32.partialorder %v191_v15, %v193_v17  ;;  %v199_v25 = vcvt.f32.s32 %v193_v17 }
 0x4ef   :  { %v195_v22 = vsel %vm194_vm2, %v190_v21, inf }
 0x4f0   :  { %196 = vmin.xlane.f32.xlu0 %v195_v22  ;;  %v200_v27 = vshll.u32 %v199_v25, 16 }
 0x563   :  { %v197_v26 = vpop.xlane.xlu0 %196 }
 0x564   :  { %v198_v28 = vcvt.f32.s32 %v197_v26 }
 0x566   :  { %v201_v29 = vadd.s32 %v200_v27, %v198_v28 }
 0x568   :  { %vm202_vm3 = vcmp.eq.s32.totalorder %v722_v23, %v201_v29 }
 0x569   :  { %v206_v30 = vsel %vm202_vm3, %v715_v19, -1e+30  ;;  %v203_v31 = vsel %vm202_vm3, %v713_v18, -1e+30 }
 0x56a   :  { %207 = vmax.xlane.f32.xlu2 %v206_v30  ;;  %204 = vmax.xlane.f32.xlu1 %v203_v31 }
 0x5dd   :  { %v789_v32 = vpop.xlane.xlu2 %207  ;;  %v791_v33 = vpop.xlane.xlu1 %204 }
 0x5de   :  { %v209_v34 = vmin.f32 %v789_v32, %v715_v19  ;;  %v210_v35 = vmax.f32 %v791_v33, %v713_v18  ;;  %v213_v36 = vsub.f32 %v789_v32, %v791_v33 }
 0x5e0   :  { %v211_v37 = vsub.f32 %v209_v34, %v210_v35  ;;  %v214_v41 = vadd.f32 %v213_v36, %v719_v20 }
 0x5e2   :  { %v212_v38 = vmax.f32 %v211_v37, 0.0 }
 0x5e4   :  { %v215_v42 = vsub.f32 %v214_v41, %v212_v38 }
 0x5e6   :  { %v216_v43 = vmul.f32 0.5, %v215_v42 }
 0x5e8   :  { %vm217_vm4 = vcmp.gt.f32.partialorder %v212_v38, %v216_v43 }
 0x5e9   :  { %vm218_vm6 = vmor %vm217_vm4, %vm202_vm3 }
 0x5ea   :  { %vm221_vm8 = vmand %vm218_vm6, %vm185_vm5 }
 0x5eb   :  { %v222_v44 = vsel %vm221_vm8, -1e+30, %v175_v11 }
 0x5ec   :  { %230 = vmax.xlane.f32.xlu0 %v222_v44 }
 0x65f   :  { %v805_v45 = vpop.xlane.xlu0 %230 }
 0x660   :  { %vm233_vm9 = vcmp.eq.f32.partialorder %v222_v44, %v805_v45  ;;  %vm232_vm13 = vcmp.gt.f32.partialorder %v805_v45, -5e+29 }
 0x661   :  { %v234_v46 = vsel %vm233_vm9, %v722_v23, 128 }
 0x662   :  { %v236_v47 = vshra.s32 %v234_v46, 16  ;;  %v235_v49 = vand.u32 65535, %v234_v46 }
 0x664   :  { %v238_v48 = vcvt.s32.f32 %v236_v47  ;;  %v237_v52 = vcvt.s32.f32 %v235_v49 }
 0x666   :  { %239 = vmin.xlane.f32.xlu1 %v238_v48 }
 0x6d9   :  { %v240_v51 = vpop.xlane.xlu1 %239 }
 0x6da   :  { %vm241_vm10 = vcmp.eq.f32.partialorder %v238_v48, %v240_v51  ;;  %v246_v54 = vcvt.f32.s32 %v240_v51 }
 0x6db   :  { %v242_v53 = vsel %vm241_vm10, %v237_v52, inf }
 0x6dc   :  { %243 = vmin.xlane.f32.xlu2 %v242_v53  ;;  %v247_v56 = vshll.u32 %v246_v54, 16 }
 0x74f   :  { %v244_v55 = vpop.xlane.xlu2 %243 }
 0x750   :  { %v245_v57 = vcvt.f32.s32 %v244_v55 }
 0x752   :  { %v248_v58 = vadd.s32 %v247_v56, %v245_v57 }
 0x754   :  { %vm249_vm11 = vcmp.eq.s32.totalorder %v722_v23, %v248_v58 }
 0x755   :  { %v253_v59 = vsel %vm249_vm11, %v715_v19, -1e+30  ;;  %v250_v60 = vsel %vm249_vm11, %v713_v18, -1e+30 }
 0x756   :  { %254 = vmax.xlane.f32.xlu1 %v253_v59  ;;  %251 = vmax.xlane.f32.xlu0 %v250_v60 }
 0x7c9   :  { %v816_v61 = vpop.xlane.xlu1 %254  ;;  %v818_v62 = vpop.xlane.xlu0 %251 }
 0x7ca   :  { %v256_v63 = vmin.f32 %v816_v61, %v715_v19  ;;  %v257_v0 = vmax.f32 %v818_v62, %v713_v18  ;;  %v260_v3 = vsub.f32 %v816_v61, %v818_v62 }
 0x7cc   :  { %v258_v4 = vsub.f32 %v256_v63, %v257_v0  ;;  %v261_v6 = vadd.f32 %v260_v3, %v719_v20 }
 0x7ce   :  { %v259_v5 = vmax.f32 %v258_v4, 0.0 }
 0x7d0   :  { %v262_v7 = vsub.f32 %v261_v6, %v259_v5 }
 0x7d2   :  { %v263_v8 = vmul.f32 0.5, %v262_v7 }
 0x7d4   :  { %vm264_vm12 = vcmp.gt.f32.partialorder %v259_v5, %v263_v8 }
 0x7d5   :  { %vm265_vm15 = vmor %vm264_vm12, %vm249_vm11 }
 0x7d6   :  { %vm268_vm0 = vmand %vm265_vm15, %vm232_vm13 }
 0x7d7   :  { %v269_v9 = vsel %vm268_vm0, -1e+30, %v222_v44 }
 0x7d8   :  { %277 = vmax.xlane.f32.xlu2 %v269_v9 }
 0x84b   :  { %v832_v10 = vpop.xlane.xlu2 %277 }
 0x84c   :  { %vm280_vm1 = vcmp.eq.f32.partialorder %v269_v9, %v832_v10  ;;  %vm279_vm6 = vcmp.gt.f32.partialorder %v832_v10, -5e+29 }
 0x84d   :  { %v281_v11 = vsel %vm280_vm1, %v722_v23, 128 }
 0x84e   :  { %v283_v13 = vshra.s32 %v281_v11, 16  ;;  %v282_v15 = vand.u32 65535, %v281_v11 }
 0x850   :  { %v285_v14 = vcvt.s32.f32 %v283_v13  ;;  %v284_v17 = vcvt.s32.f32 %v282_v15 }
 0x852   :  { %286 = vmin.xlane.f32.xlu0 %v285_v14 }
 0x8c5   :  { %v287_v16 = vpop.xlane.xlu0 %286 }
 0x8c6   :  { %vm288_vm2 = vcmp.eq.f32.partialorder %v285_v14, %v287_v16  ;;  %v293_v22 = vcvt.f32.s32 %v287_v16 }
 0x8c7   :  { %v289_v21 = vsel %vm288_vm2, %v284_v17, inf }
 0x8c8   :  { %290 = vmin.xlane.f32.xlu1 %v289_v21  ;;  %v294_v26 = vshll.u32 %v293_v22, 16 }
 0x93b   :  { %v291_v25 = vpop.xlane.xlu1 %290 }
 0x93c   :  { %v292_v27 = vcvt.f32.s32 %v291_v25 }
 0x93e   :  { %v295_v28 = vadd.s32 %v294_v26, %v292_v27 }
 0x940   :  { %vm296_vm3 = vcmp.eq.s32.totalorder %v722_v23, %v295_v28 }
 0x941   :  { %v300_v29 = vsel %vm296_vm3, %v715_v19, -1e+30  ;;  %v297_v30 = vsel %vm296_vm3, %v713_v18, -1e+30 }
 0x942   :  { %301 = vmax.xlane.f32.xlu0 %v300_v29  ;;  %298 = vmax.xlane.f32.xlu2 %v297_v30 }
 0x9b5   :  { %v843_v31 = vpop.xlane.xlu0 %301  ;;  %v845_v34 = vpop.xlane.xlu2 %298 }
 0x9b6   :  { %v303_v35 = vmin.f32 %v843_v31, %v715_v19  ;;  %v304_v36 = vmax.f32 %v845_v34, %v713_v18  ;;  %v307_v37 = vsub.f32 %v843_v31, %v845_v34 }
 0x9b8   :  { %v305_v38 = vsub.f32 %v303_v35, %v304_v36  ;;  %v308_v42 = vadd.f32 %v307_v37, %v719_v20 }
 0x9ba   :  { %v306_v41 = vmax.f32 %v305_v38, 0.0 }
 0x9bc   :  { %v309_v43 = vsub.f32 %v308_v42, %v306_v41 }
 0x9be   :  { %v310_v44 = vmul.f32 0.5, %v309_v43 }
 0x9c0   :  { %vm311_vm4 = vcmp.gt.f32.partialorder %v306_v41, %v310_v44 }
 0x9c1   :  { %vm312_vm8 = vmor %vm311_vm4, %vm296_vm3 }
 0x9c2   :  { %vm315_vm9 = vmand %vm312_vm8, %vm279_vm6 }
 0x9c3   :  { %v316_v46 = vsel %vm315_vm9, -1e+30, %v269_v9 }
 0x9c4   :  { %324 = vmax.xlane.f32.xlu1 %v316_v46 }
 0xa37   :  { %v859_v47 = vpop.xlane.xlu1 %324 }
 0xa38   :  { %vm327_vm10 = vcmp.eq.f32.partialorder %v316_v46, %v859_v47  ;;  %vm326_vm0 = vcmp.gt.f32.partialorder %v859_v47, -5e+29 }
 0xa39   :  { %v328_v48 = vsel %vm327_vm10, %v722_v23, 128 }
 0xa3a   :  { %v330_v49 = vshra.s32 %v328_v48, 16  ;;  %v329_v52 = vand.u32 65535, %v328_v48 }
 0xa3c   :  { %v332_v51 = vcvt.s32.f32 %v330_v49  ;;  %v331_v54 = vcvt.s32.f32 %v329_v52 }
 0xa3e   :  { %333 = vmin.xlane.f32.xlu2 %v332_v51 }
 0xab1   :  { %v334_v53 = vpop.xlane.xlu2 %333 }
 0xab2   :  { %vm335_vm11 = vcmp.eq.f32.partialorder %v332_v51, %v334_v53  ;;  %v340_v56 = vcvt.f32.s32 %v334_v53 }
 0xab3   :  { %v336_v55 = vsel %vm335_vm11, %v331_v54, inf }
 0xab4   :  { %337 = vmin.xlane.f32.xlu0 %v336_v55  ;;  %v341_v58 = vshll.u32 %v340_v56, 16 }
 0xb27   :  { %v338_v57 = vpop.xlane.xlu0 %337 }
 0xb28   :  { %v339_v59 = vcvt.f32.s32 %v338_v57 }
 0xb2a   :  { %v342_v60 = vadd.s32 %v341_v58, %v339_v59 }
 0xb2c   :  { %vm343_vm12 = vcmp.eq.s32.totalorder %v722_v23, %v342_v60 }
 0xb2d   :  { %v347_v63 = vsel %vm343_vm12, %v715_v19, -1e+30  ;;  %v344_v0 = vsel %vm343_vm12, %v713_v18, -1e+30 }
 0xb2e   :  { %348 = vmax.xlane.f32.xlu2 %v347_v63  ;;  %345 = vmax.xlane.f32.xlu1 %v344_v0 }
 0xba1   :  { %v870_v3 = vpop.xlane.xlu2 %348  ;;  %v872_v4 = vpop.xlane.xlu1 %345 }
 0xba2   :  { %v350_v5 = vmin.f32 %v870_v3, %v715_v19  ;;  %v351_v6 = vmax.f32 %v872_v4, %v713_v18  ;;  %v354_v7 = vsub.f32 %v870_v3, %v872_v4 }
 0xba4   :  { %v352_v8 = vsub.f32 %v350_v5, %v351_v6  ;;  %v355_v11 = vadd.f32 %v354_v7, %v719_v20 }
 0xba6   :  { %v353_v9 = vmax.f32 %v352_v8, 0.0 }
 0xba8   :  { %v356_v13 = vsub.f32 %v355_v11, %v353_v9 }
 0xbaa   :  { %v357_v14 = vmul.f32 0.5, %v356_v13 }
 0xbac   :  { %vm358_vm15 = vcmp.gt.f32.partialorder %v353_v9, %v357_v14 }
 0xbad   :  { %vm359_vm1 = vmor %vm358_vm15, %vm343_vm12 }
 0xbae   :  { %vm362_vm2 = vmand %vm359_vm1, %vm326_vm0 }
 0xbaf   :  { %v363_v15 = vsel %vm362_vm2, -1e+30, %v316_v46 }
 0xbb0   :  { %371 = vmax.xlane.f32.xlu0 %v363_v15 }
 0xc23   :  { %v886_v16 = vpop.xlane.xlu0 %371 }
 0xc24   :  { %vm374_vm3 = vcmp.eq.f32.partialorder %v363_v15, %v886_v16  ;;  %vm1134_vm10 = vcmp.gt.f32.partialorder %v886_v16, -5e+29 }
 0xc25   :  { %v375_v17 = vsel %vm374_vm3, %v722_v23, 128 }
 0xc26   :  { %v377_v21 = vshra.s32 %v375_v17, 16  ;;  %v376_v25 = vand.u32 65535, %v375_v17 }
 0xc28   :  { %v379_v22 = vcvt.s32.f32 %v377_v21  ;;  %v378_v27 = vcvt.s32.f32 %v376_v25 }
 0xc2a   :  { %380 = vmin.xlane.f32.xlu1 %v379_v22 }
 0xc9d   :  { %v381_v26 = vpop.xlane.xlu1 %380 }
 0xc9e   :  { %vm382_vm4 = vcmp.eq.f32.partialorder %v379_v22, %v381_v26  ;;  %v387_v29 = vcvt.f32.s32 %v381_v26 }
 0xc9f   :  { %v383_v28 = vsel %vm382_vm4, %v378_v27, inf }
 0xca0   :  { %384 = vmin.xlane.f32.xlu2 %v383_v28  ;;  %v388_v35 = vshll.u32 %v387_v29, 16 }
 0xd13   :  { %v385_v30 = vpop.xlane.xlu2 %384 }
 0xd14   :  { %v386_v36 = vcvt.f32.s32 %v385_v30 }
 0xd16   :  { %v389_v37 = vadd.s32 %v388_v35, %v386_v36 }
 0xd18   :  { %vm390_vm8 = vcmp.eq.s32.totalorder %v722_v23, %v389_v37 }
 0xd19   :  { %v394_v38 = vsel %vm390_vm8, %v715_v19, -1e+30  ;;  %v391_v41 = vsel %vm390_vm8, %v713_v18, -1e+30 }
 0xd1a   :  { %395 = vmax.xlane.f32.xlu1 %v394_v38  ;;  %392 = vmax.xlane.f32.xlu0 %v391_v41 }
 0xd8d   :  { %v897_v42 = vpop.xlane.xlu1 %395  ;;  %v899_v43 = vpop.xlane.xlu0 %392 }
 0xd8e   :  { %v397_v44 = vmin.f32 %v897_v42, %v715_v19  ;;  %v398_v46 = vmax.f32 %v899_v43, %v713_v18  ;;  %v401_v48 = vsub.f32 %v897_v42, %v899_v43 }
 0xd90   :  { %v399_v49 = vsub.f32 %v397_v44, %v398_v46  ;;  %v402_v52 = vadd.f32 %v401_v48, %v719_v20 }
 0xd92   :  { %v400_v51 = vmax.f32 %v399_v49, 0.0 }
 0xd94   :  { %v403_v53 = vsub.f32 %v402_v52, %v400_v51 }
 0xd96   :  { %v404_v54 = vmul.f32 0.5, %v403_v53 }
 0xd98   :  { %vm405_vm9 = vcmp.gt.f32.partialorder %v400_v51, %v404_v54 }
 0xd99   :  { %vm406_vm11 = vmor %vm405_vm9, %vm390_vm8 }
 0xd9a   :  { %vm409_vm12 = vmand %vm406_vm11, %vm1134_vm10  ;;  %vm270_vm10 = vcmp.eq.s32.totalorder %v722_v23, 3 }
 0xd9b   :  { %v410_v55 = vsel %vm409_vm12, -1e+30, %v363_v15 }
 0xd9c   :  { %418 = vmax.xlane.f32.xlu2 %v410_v55 }
 0xe0f   :  { %v913_v56 = vpop.xlane.xlu2 %418 }
 0xe10   :  { %vm421_vm15 = vcmp.eq.f32.partialorder %v410_v55, %v913_v56  ;;  %vm1133_vm4 = vcmp.gt.f32.partialorder %v913_v56, -5e+29 }
 0xe11   :  { %v422_v57 = vsel %vm421_vm15, %v722_v23, 128 }
 0xe12   :  { %v424_v58 = vshra.s32 %v422_v57, 16  ;;  %v423_v60 = vand.u32 65535, %v422_v57 }
 0xe14   :  { %v426_v59 = vcvt.s32.f32 %v424_v58  ;;  %v425_v0 = vcvt.s32.f32 %v423_v60 }
 0xe16   :  { %427 = vmin.xlane.f32.xlu0 %v426_v59 }
 0xe89   :  { %v428_v63 = vpop.xlane.xlu0 %427 }
 0xe8a   :  { %vm429_vm1 = vcmp.eq.f32.partialorder %v426_v59, %v428_v63  ;;  %v434_v6 = vcvt.f32.s32 %v428_v63 }
 0xe8b   :  { %v430_v5 = vsel %vm429_vm1, %v425_v0, inf }
 0xe8c   :  { %431 = vmin.xlane.f32.xlu1 %v430_v5  ;;  %v435_v8 = vshll.u32 %v434_v6, 16 }
 0xeff   :  { %v432_v7 = vpop.xlane.xlu1 %431 }
 0xf00   :  { %v433_v9 = vcvt.f32.s32 %v432_v7 }
 0xf02   :  { %v436_v11 = vadd.s32 %v435_v8, %v433_v9 }
 0xf04   :  { %vm437_vm2 = vcmp.eq.s32.totalorder %v722_v23, %v436_v11 }
 0xf05   :  { %v441_v13 = vsel %vm437_vm2, %v715_v19, -1e+30  ;;  %v438_v14 = vsel %vm437_vm2, %v713_v18, -1e+30 }
 0xf06   :  { %442 = vmax.xlane.f32.xlu0 %v441_v13  ;;  %439 = vmax.xlane.f32.xlu2 %v438_v14 }
 0xf79   :  { %v924_v15 = vpop.xlane.xlu0 %442  ;;  %v926_v17 = vpop.xlane.xlu2 %439 }
 0xf7a   :  { %v444_v21 = vmin.f32 %v924_v15, %v715_v19  ;;  %v445_v22 = vmax.f32 %v926_v17, %v713_v18  ;;  %v448_v25 = vsub.f32 %v924_v15, %v926_v17 }
 0xf7c   :  { %v446_v26 = vsub.f32 %v444_v21, %v445_v22  ;;  %v449_v28 = vadd.f32 %v448_v25, %v719_v20 }
 0xf7e   :  { %v447_v27 = vmax.f32 %v446_v26, 0.0 }
 0xf80   :  { %v450_v29 = vsub.f32 %v449_v28, %v447_v27 }
 0xf82   :  { %v451_v30 = vmul.f32 0.5, %v450_v29 }
 0xf84   :  { %vm452_vm3 = vcmp.gt.f32.partialorder %v447_v27, %v451_v30 }
 0xf85   :  { %vm453_vm8 = vmor %vm452_vm3, %vm437_vm2 }
 0xf86   :  { %vm456_vm9 = vmand %vm453_vm8, %vm1133_vm4 }
 0xf87   :  { %v457_v35 = vsel %vm456_vm9, -1e+30, %v410_v55  ;;  %vm129_vm9 = vcmp.eq.s32.totalorder %v722_v23, 0 }
 0xf88   :  { %465 = vmax.xlane.f32.xlu1 %v457_v35  ;;  %vm972_vm4 = vmand %vm129_vm9, %vm91_vm7  ;;  %vm364_vm7 = vcmp.eq.s32.totalorder %v722_v23, 5  ;;  %vm458_vm9 = vcmp.eq.s32.totalorder %v722_v23, 7 }
 0xf89   :  { %v135_v22 = vsel %vm972_vm4, %v724_v24, -1.0 }
 0xffb   :  { %v940_v36 = vpop.xlane.xlu1 %465 }
 0xffc   :  { %vm468_vm11 = vcmp.eq.f32.partialorder %v457_v35, %v940_v36  ;;  %vm467_vm2 = vcmp.gt.f32.partialorder %v940_v36, -5e+29 }
 0xffd   :  { %v469_v37 = vsel %vm468_vm11, %v722_v23, 128  ;;  %vm176_vm11 = vcmp.eq.s32.totalorder %v722_v23, 1 }
 0xffe   :  { %v471_v38 = vshra.s32 %v469_v37, 16  ;;  %v470_v44 = vand.u32 65535, %v469_v37 }
0x1000   :  { %v473_v41 = vcvt.s32.f32 %v471_v38  ;;  %v472_v48 = vcvt.s32.f32 %v470_v44 }
0x1002   :  { %474 = vmin.xlane.f32.xlu2 %v473_v41 }
0x1075   :  { %v475_v46 = vpop.xlane.xlu2 %474 }
0x1076   :  { %vm476_vm12 = vcmp.eq.f32.partialorder %v473_v41, %v475_v46  ;;  %v481_v51 = vcvt.f32.s32 %v475_v46 }
0x1077   :  { %v477_v49 = vsel %vm476_vm12, %v472_v48, inf  ;;  %vm223_vm12 = vcmp.eq.s32.totalorder %v722_v23, 2 }
0x1078   :  { %478 = vmin.xlane.f32.xlu0 %v477_v49  ;;  %v482_v53 = vshll.u32 %v481_v51, 16 }
0x10eb   :  { %v479_v52 = vpop.xlane.xlu0 %478 }
0x10ec   :  { %v480_v54 = vcvt.f32.s32 %v479_v52 }
0x10ee   :  { %v483_v55 = vadd.s32 %v482_v53, %v480_v54 }
0x10f0   :  { %vm484_vm15 = vcmp.eq.s32.totalorder %v722_v23, %v483_v55 }
0x10f1   :  { %v488_v57 = vsel %vm484_vm15, %v715_v19, -1e+30  ;;  %v485_v58 = vsel %vm484_vm15, %v713_v18, -1e+30 }
0x10f2   :  { %489 = vmax.xlane.f32.xlu2 %v488_v57  ;;  %486 = vmax.xlane.f32.xlu1 %v485_v58 }
0x1165   :  { %v951_v59 = vpop.xlane.xlu2 %489  ;;  %v953_v60 = vpop.xlane.xlu1 %486 }
0x1166   :  { %v491_v63 = vmin.f32 %v951_v59, %v715_v19  ;;  %v492_v0 = vmax.f32 %v953_v60, %v713_v18  ;;  %v495_v5 = vsub.f32 %v951_v59, %v953_v60 }
0x1168   :  { %v493_v6 = vsub.f32 %v491_v63, %v492_v0  ;;  %v496_v7 = vadd.f32 %v495_v5, %v719_v20  ;;  %v134_v0 = vsel %vm972_vm4, %v735_v39, -1.0  ;;  %v133_v5 = vsel %vm972_vm4, %v737_v40, -1.0 }
0x116a   :  { %v494_v8 = vmax.f32 %v493_v6, 0.0 }
0x116c   :  { %v497_v9 = vsub.f32 %v496_v7, %v494_v8 }
0x116e   :  { %v498_v11 = vmul.f32 0.5, %v497_v9 }
0x1170   :  { %vm499_vm1 = vcmp.gt.f32.partialorder %v494_v8, %v498_v11 }
0x1171   :  { %vm500_vm3 = vmor %vm499_vm1, %vm484_vm15  ;;  %vm317_vm1 = vcmp.eq.s32.totalorder %v722_v23, 4 }
0x1172   :  { %vm503_vm8 = vmand %vm500_vm3, %vm467_vm2 }
0x1173   :  { %v504_v13 = vsel %vm503_vm8, -1e+30, %v457_v35  ;;  %vm979_vm15 = vmand %vm176_vm11, %vm138_vm14  ;;  %vm411_vm8 = vcmp.eq.s32.totalorder %v722_v23, 6 }
0x1174   :  { %512 = vmax.xlane.f32.xlu0 %v504_v13  ;;  %vm986_vm3 = vmand %vm223_vm12, %vm185_vm5  ;;  %v182_v26 = vsel %vm979_vm15, %v751_v50, %v135_v22  ;;  %v181_v6 = vsel %vm979_vm15, %v762_v1, %v134_v0 }
0x1175   :  { %vm996_vm14 = vmand %vm270_vm10, %vm232_vm13  ;;  %v229_v24 = vsel %vm986_vm3, %v778_v12, %v182_v26  ;;  %vm505_vm10 = vcmp.eq.s32.totalorder %v722_v23, 8 }
0x1176   :  { %vm1006_vm5 = vmand %vm317_vm1, %vm279_vm6  ;;  %v276_v50 = vsel %vm996_vm14, %v805_v45, %v229_v24  ;;  %vm1147_vm6 = vcmp.gt.f32.partialorder %v886_v16, -5e+29 }
0x1177   :  { %vm1016_vm13 = vmand %vm364_vm7, %vm326_vm0  ;;  %v323_v12 = vsel %vm1006_vm5, %v832_v10, %v276_v50  ;;  %vm1150_vm0 = vcmp.gt.f32.partialorder %v913_v56, -5e+29  ;;  %vm538_vm7 = vcmp.eq.s32.totalorder %v722_v23, 9 }
0x1178   :  { %vm1026_vm11 = vmand %vm411_vm8, %vm1147_vm6  ;;  %v370_v45 = vsel %vm1016_vm13, %v859_v47, %v323_v12 }
0x1179   :  { %vm1035_vm12 = vmand %vm458_vm9, %vm1150_vm0  ;;  %v417_v10 = vsel %vm1026_vm11, %v886_v16, %v370_v45 }
0x117a   :  { %vm1044_vm1 = vmand %vm505_vm10, %vm467_vm2  ;;  %v464_v38 = vsel %vm1035_vm12, %v913_v56, %v417_v10 }
0x117b   :  { %v511_v47 = vsel %vm1044_vm1, %v940_v36, %v464_v38 }
0x11e7   :  { %v513_v37 = vpop.xlane.xlu0 %512 }
0x11e8   :  { %vm514_vm8 = vcmp.gt.f32.partialorder %v513_v37, -5e+29  ;;  %vm515_vm9 = vcmp.eq.f32.partialorder %v504_v13, %v513_v37 }
0x11e9   :  { %vm1058_vm2 = vmand %vm538_vm7, %vm514_vm8  ;;  %v516_v44 = vsel %vm515_vm9, %v722_v23, 128 }
0x11ea   :  { %v546_v16 = vsel %vm1058_vm2, %v513_v37, %v511_v47  ;;  %v518_v46 = vshra.s32 %v516_v44, 16  ;;  %v517_v56 = vand.u32 65535, %v516_v44 }
0x11eb   :  { %549 = vst [vmem:[#allocation8 + $0x10] sm:$0xff] %v546_v16 }
0x11ec   :  { %v520_v48 = vcvt.s32.f32 %v518_v46  ;;  %v519_v51 = vcvt.s32.f32 %v517_v56 }
0x11ee   :  { %521 = vmin.xlane.f32.xlu1 %v520_v48 }
0x1261   :  { %v522_v49 = vpop.xlane.xlu1 %521 }
0x1262   :  { %vm523_vm10 = vcmp.eq.f32.partialorder %v520_v48, %v522_v49  ;;  %v528_v36 = vcvt.f32.s32 %v522_v49 }
0x1263   :  { %v524_v52 = vsel %vm523_vm10, %v519_v51, inf }
0x1264   :  { %525 = vmin.xlane.f32.xlu2 %v524_v52  ;;  %v529_v54 = vshll.u32 %v528_v36, 16 }
0x12d7   :  { %v526_v53 = vpop.xlane.xlu2 %525 }
0x12d8   :  { %v527_v55 = vcvt.f32.s32 %v526_v53 }
0x12da   :  { %v530_v57 = vadd.s32 %v529_v54, %v527_v55 }
0x12dc   :  { %vm531_vm6 = vcmp.eq.s32.totalorder %v722_v23, %v530_v57 }
0x12dd   :  { %v535_v58 = vsel %vm531_vm6, %v715_v19, -1e+30  ;;  %v532_v63 = vsel %vm531_vm6, %v713_v18, -1e+30  ;;  %v180_v19 = vsel %vm979_vm15, %v764_v2, %v133_v5  ;;  %v228_v18 = vsel %vm986_vm3, %v789_v32, %v181_v6 }
0x12de   :  { %536 = vmax.xlane.f32.xlu1 %v535_v58  ;;  %533 = vmax.xlane.f32.xlu0 %v532_v63  ;;  %v227_v23 = vsel %vm986_vm3, %v791_v33, %v180_v19  ;;  %v275_v39 = vsel %vm996_vm14, %v816_v61, %v228_v18 }
0x12df   :  { %v274_v40 = vsel %vm996_vm14, %v818_v62, %v227_v23  ;;  %v322_v1 = vsel %vm1006_vm5, %v843_v31, %v275_v39 }
0x12e0   :  { %v321_v2 = vsel %vm1006_vm5, %v845_v34, %v274_v40  ;;  %v369_v32 = vsel %vm1016_vm13, %v870_v3, %v322_v1 }
0x12e1   :  { %v368_v33 = vsel %vm1016_vm13, %v872_v4, %v321_v2  ;;  %v416_v61 = vsel %vm1026_vm11, %v897_v42, %v369_v32 }
0x12e2   :  { %v415_v62 = vsel %vm1026_vm11, %v899_v43, %v368_v33  ;;  %v463_v31 = vsel %vm1035_vm12, %v924_v15, %v416_v61 }
0x12e3   :  { %v462_v34 = vsel %vm1035_vm12, %v926_v17, %v415_v62  ;;  %v510_v3 = vsel %vm1044_vm1, %v951_v59, %v463_v31 }
0x12e4   :  { %v509_v42 = vsel %vm1044_vm1, %v953_v60, %v462_v34 }
0x1351   :  { %v537_v4 = vpop.xlane.xlu1 %536  ;;  %v534_v43 = vpop.xlane.xlu0 %533 }
0x1352   :  { %v545_v7 = vsel %vm1058_vm2, %v537_v4, %v510_v3  ;;  %v544_v15 = vsel %vm1058_vm2, %v534_v43, %v509_v42 }
0x1353   :  { %548 = vst [vmem:[#allocation8 + $0x8] sm:$0xff] %v545_v7 }
0x1354   :  { %547 = vst [vmem:[#allocation8] sm:$0xff] %v544_v15 }
0x1355   :  { %560 = dma.vmem_to_hbm [thread:$0]  %s556_s2, 384, %s558_s30, [#allocation4]  }
0x1356   :  { %676 = dma.done.wait [#allocation4], 384  }
0x1357   :  { %677 = vsyncadd [#allocation4], 4294966912 }
0x1358   :  { %565 = vsyncpa [#allocation3], 1 }
0x1359   :  { %566 = vsyncpa [#allocation6], 1 }
0x135a   :  { %567 = vsyncpa [#allocation4], 1 }

</bundles_post_ra>
